<compile_context>
chip_gen: v7x
topology: tpu7x:2x2x1
jax: 0.10.0
libtpu: 0.0.40
codegen_flags: <defaults>
</compile_context>

<pallas_src>
import math

import jax
import jax.numpy as jnp
from jax.experimental import pallas as pl
from jax.experimental.pallas import tpu as pltpu


def rnn_model_forward(inputs, state, params, *, time_block=8):
    """Pallas equivalent of RNNModel.forward.

    inputs : (batch, num_steps) int32 token ids
    state  : (1, batch, num_hiddens) float32
    returns (output, state_out) with
      output    : (num_steps * batch, vocab_size) float32
      state_out : (1, batch, num_hiddens) float32
    """
    w_ih, w_hh, b_ih, b_hh, w_lin, b_lin = (
        params["w_ih"], params["w_hh"], params["b_ih"], params["b_hh"],
        params["w_lin"], params["b_lin"])

    num_hiddens, vocab_size = w_ih.shape
    batch_size, num_steps = inputs.shape
    T, B, V, H = num_steps, batch_size, vocab_size, num_hiddens

    # ---- wrapper-side prep (cheap XLA glue, off the serial chain) -----------
    ids = inputs.T.astype(jnp.int32)                       # (T, B) time-major
    # x_t @ W_ih^T for a one-hot x_t is exactly a row gather of W_ih^T.
    x_proj = jnp.take(w_ih.T.astype(jnp.float32), ids, axis=0)   # (T, B, H) f32
    whh_t = w_hh.T.astype(jnp.bfloat16)                    # (H, H) MXU operand
    bias = (b_ih + b_hh).reshape(1, H).astype(jnp.float32)
    wlin_t = w_lin.T.astype(jnp.bfloat16)                  # (H, V) MXU operand
    blin = b_lin.reshape(1, V).astype(jnp.float32)
    h0 = state.astype(jnp.float32)                         # (1, B, H)

    # time blocking (amortize the ~0.35us per-grid-step overhead)
    Tt = max(1, min(time_block, T))
    while T % Tt != 0:
        Tt -= 1
    nt = T // Tt
    rows_per_block = Tt * B

    # ------------------------------ fused kernel -----------------------------
    def rnn_kernel(xproj_ref, h0_ref, whh_ref, bias_ref, wlin_ref, blin_ref,
                   out_ref, hlast_ref, h_scratch, hblk_scratch):
        ti = pl.program_id(0)

        @pl.when(ti == 0)
        def _():
            h_scratch[...] = h0_ref[0]                     # (B, H) f32

        whh = whh_ref[...]                                 # (H, H) bf16, resident
        b_bcast = jnp.broadcast_to(bias_ref[...], (B, H))  # hoisted out of loop
        h = h_scratch[...]                                 # (B, H) f32 carry

        # Static unroll over the time block (Tt <= 8); switch to
        # lax.fori_loop(..., unroll=True) if time_block is ever raised.
        for s in range(Tt):
            rec = jnp.dot(h.astype(jnp.bfloat16), whh,
                          preferred_element_type=jnp.float32)
            h = jnp.tanh(xproj_ref[s] + rec + b_bcast)     # (B, H) f32
            hblk_scratch[pl.ds(s * B, B), :] = h           # stash for the head
        h_scratch[...] = h
        hlast_ref[0] = h                                   # f32 final state

        # Fused Linear head: one lane-dense MXU matmul per time block.
        out_ref[...] = (
            jnp.dot(hblk_scratch[...].astype(jnp.bfloat16), wlin_ref[...],
                    preferred_element_type=jnp.float32)
            + blin_ref[...])

    logits, state_out = pl.pallas_call(
        rnn_kernel,
        grid=(nt,),
        in_specs=[
            pl.BlockSpec((Tt, B, H), lambda ti: (ti, 0, 0)),   # x_proj stream
            pl.BlockSpec((1, B, H), lambda ti: (0, 0, 0)),     # h0 (resident)
            pl.BlockSpec((H, H), lambda ti: (0, 0)),           # W_hh^T (resident)
            pl.BlockSpec((1, H), lambda ti: (0, 0)),           # rnn bias
            pl.BlockSpec((H, V), lambda ti: (0, 0)),           # W_lin^T (resident)
            pl.BlockSpec((1, V), lambda ti: (0, 0)),           # linear bias
        ],
        out_specs=[
            pl.BlockSpec((rows_per_block, V), lambda ti: (ti, 0)),  # logits
            pl.BlockSpec((1, B, H), lambda ti: (0, 0, 0)),          # final state
        ],
        out_shape=[
            jax.ShapeDtypeStruct((T * B, V), jnp.float32),
            jax.ShapeDtypeStruct((1, B, H), jnp.float32),
        ],
        scratch_shapes=[
            pltpu.VMEM((B, H), jnp.float32),                 # hidden-state carry
            pltpu.VMEM((rows_per_block, H), jnp.float32),    # per-block h stack
        ],
        compiler_params=pltpu.CompilerParams(
            dimension_semantics=("arbitrary",)),             # serial recurrence
    )(x_proj, h0, whh_t, bias, wlin_t, blin)

    return logits, state_out


def init_params(vocab_size, num_hiddens, key):
    """Deterministic init matching PyTorch nn.RNN / nn.Linear shapes."""
    k = 1.0 / math.sqrt(num_hiddens)
    keys = jax.random.split(key, 6)
    w_ih = jax.random.uniform(keys[0], (num_hiddens, vocab_size), jnp.float32, -k, k)
    w_hh = jax.random.uniform(keys[1], (num_hiddens, num_hiddens), jnp.float32, -k, k)
    b_ih = jax.random.uniform(keys[2], (num_hiddens,), jnp.float32, -k, k)
    b_hh = jax.random.uniform(keys[3], (num_hiddens,), jnp.float32, -k, k)
    w_lin = jax.random.uniform(keys[4], (vocab_size, num_hiddens), jnp.float32, -k, k)
    b_lin = jax.random.uniform(keys[5], (vocab_size,), jnp.float32, -k, k)
    return dict(w_ih=w_ih, w_hh=w_hh, b_ih=b_ih, b_hh=b_hh,
                w_lin=w_lin, b_lin=b_lin)


def reference_forward(inputs, state, params):
    """Pure-JAX reference (same bf16 MXU-operand dtypes as the kernel)."""
    # TODO(synk): strict f32 parity with PyTorch nn.RNN would keep W_hh/h in
    # f32 on the MXU; kept bf16 here to match the kernel's compute path.
    w_ih, w_hh, b_ih, b_hh, w_lin, b_lin = (
        params["w_ih"], params["w_hh"], params["b_ih"], params["b_hh"],
        params["w_lin"], params["b_lin"])
    H = w_ih.shape[0]
    ids = inputs.T                                          # (T, B)
    x_proj = jnp.take(w_ih.T, ids, axis=0)                  # == one_hot @ W_ih^T
    whh_t = w_hh.T.astype(jnp.bfloat16)
    bias = (b_ih + b_hh).astype(jnp.float32)
    h0 = state[0]

    def step(h, xp):
        h_new = jnp.tanh(
            xp + jnp.dot(h.astype(jnp.bfloat16), whh_t,
                         preferred_element_type=jnp.float32) + bias)
        return h_new, h_new

    h_final, ys = jax.lax.scan(step, h0, x_proj)
    y_flat = ys.reshape(-1, H).astype(jnp.bfloat16)
    out = (jnp.dot(y_flat, w_lin.T.astype(jnp.bfloat16),
                   preferred_element_type=jnp.float32) + b_lin)
    return out, h_final[None]


if __name__ == "__main__":
    vocab_size = 128     # lane-dense (multiple of 128)
    num_hiddens = 256    # matches the spec's num_hiddens
    batch_size = 8       # full f32 sublanes
    num_steps = 16

    key = jax.random.PRNGKey(0)
    k_inp, k_par, k_st = jax.random.split(key, 3)

    inputs = jax.random.randint(k_inp, (batch_size, num_steps), 0, vocab_size,
                                dtype=jnp.int32)
    state = 0.1 * jax.random.normal(k_st, (1, batch_size, num_hiddens),
                                    jnp.float32)
    params = init_params(vocab_size, num_hiddens, k_par)

    output, state_out = rnn_model_forward(inputs, state, params)
    jax.block_until_ready((output, state_out))

    ref_out, ref_state = reference_forward(inputs, state, params)
    assert output.shape == (num_steps * batch_size, vocab_size)
    assert state_out.shape == (1, batch_size, num_hiddens)
    assert jnp.allclose(output, ref_out, atol=2e-2, rtol=2e-2)
    assert jnp.allclose(state_out, ref_state, atol=2e-2, rtol=2e-2)

    print("KERNEL_OK")
</pallas_src>

<mosaic_0001>
module attributes {stable_mosaic.version = 11 : i64} {
  func.func @rnn_kernel(%arg0: i32, %arg1: memref<8x8x256xf32, #tpu.memory_space<vmem>>, %arg2: memref<1x8x256xf32, #tpu.memory_space<vmem>>, %arg3: memref<256x256xbf16, #tpu.memory_space<vmem>>, %arg4: memref<1x256xf32, #tpu.memory_space<vmem>>, %arg5: memref<256x128xbf16, #tpu.memory_space<vmem>>, %arg6: memref<1x128xf32, #tpu.memory_space<vmem>>, %arg7: memref<64x128xf32, #tpu.memory_space<vmem>>, %arg8: memref<1x8x256xf32, #tpu.memory_space<vmem>>, %arg9: memref<8x256xf32, #tpu.memory_space<vmem>>, %arg10: memref<64x256xf32, #tpu.memory_space<vmem>>) attributes {dimension_semantics = [#tpu.dimension_semantics<arbitrary>], iteration_bounds = array<i64: 2>, scalar_prefetch = 0 : i64, scratch_operands = 2 : i64, tpu.core_type = #tpu.core_type<tc>, window_params = [{transform_indices = @transform_0, window_bounds = array<i64: 8, 8, 256>}, {pipeline_mode = #tpu.pipeline_mode<synchronous>, transform_indices = @transform_1, window_bounds = array<i64: 1, 8, 256>}, {pipeline_mode = #tpu.pipeline_mode<synchronous>, transform_indices = @transform_2, window_bounds = array<i64: 256, 256>}, {pipeline_mode = #tpu.pipeline_mode<synchronous>, transform_indices = @transform_3, window_bounds = array<i64: 1, 256>}, {pipeline_mode = #tpu.pipeline_mode<synchronous>, transform_indices = @transform_4, window_bounds = array<i64: 256, 128>}, {pipeline_mode = #tpu.pipeline_mode<synchronous>, transform_indices = @transform_5, window_bounds = array<i64: 1, 128>}, {transform_indices = @transform_6, window_bounds = array<i64: 64, 128>}, {pipeline_mode = #tpu.pipeline_mode<synchronous>, transform_indices = @transform_7, window_bounds = array<i64: 1, 8, 256>}]} {
    %c0_i32 = arith.constant 0 : i32
    %0 = arith.cmpi eq, %arg0, %c0_i32 : i32
    %1 = arith.extui %0 : i1 to i32
    %c0_i32_0 = arith.constant 0 : i32
    %2 = arith.cmpi ne, %1, %c0_i32_0 : i32
    scf.if %2 {
      %c0_53 = arith.constant 0 : index
      %c0_54 = arith.constant 0 : index
      %c0_55 = arith.constant 0 : index
      %84 = vector.load %arg2[%c0_53, %c0_54, %c0_55] : memref<1x8x256xf32, #tpu.memory_space<vmem>>, vector<1x8x256xf32>
      %85 = vector.shape_cast %84 : vector<1x8x256xf32> to vector<8x256xf32>
      %c0_56 = arith.constant 0 : index
      %c0_57 = arith.constant 0 : index
      %86 = vector.load %arg9[%c0_56, %c0_57] : memref<8x256xf32, #tpu.memory_space<vmem>>, vector<8x256xf32>
      tpu.vector_store %arg9[%c0_56, %c0_57], %85 {strides = array<i32>} : memref<8x256xf32, #tpu.memory_space<vmem>>, vector<8x256xf32>,
    } else {
    }
    %c0 = arith.constant 0 : index
    %c0_1 = arith.constant 0 : index
    %3 = vector.load %arg3[%c0, %c0_1] : memref<256x256xbf16, #tpu.memory_space<vmem>>, vector<256x256xbf16>
    %c0_2 = arith.constant 0 : index
    %c0_3 = arith.constant 0 : index
    %4 = vector.load %arg4[%c0_2, %c0_3] : memref<1x256xf32, #tpu.memory_space<vmem>>, vector<1x256xf32>
    %5 = vector.shape_cast %4 : vector<1x256xf32> to vector<1x256xf32>
    %6 = vector.broadcast %5 : vector<1x256xf32> to vector<8x256xf32>
    %c0_4 = arith.constant 0 : index
    %c0_5 = arith.constant 0 : index
    %7 = vector.load %arg9[%c0_4, %c0_5] : memref<8x256xf32, #tpu.memory_space<vmem>>, vector<8x256xf32>
    %8 = arith.truncf %7 : vector<8x256xf32> to vector<8x256xbf16>
    %cst = arith.constant dense<0.000000e+00> : vector<8x256xf32>
    %9 = tpu.matmul %8, %3, %cst {dimension_numbers = #tpu.dot_dimension_numbers<[1], [0], [0], [1], [0, 0, 1, 1], [], []>} : vector<8x256xbf16>, vector<256x256xbf16>, vector<8x256xf32> -> vector<8x256xf32>
    %c0_6 = arith.constant 0 : index
    %c0_7 = arith.constant 0 : index
    %c0_8 = arith.constant 0 : index
    %10 = vector.load %arg1[%c0_6, %c0_7, %c0_8] : memref<8x8x256xf32, #tpu.memory_space<vmem>>, vector<1x8x256xf32>
    %11 = vector.shape_cast %10 : vector<1x8x256xf32> to vector<8x256xf32>
    %12 = arith.addf %11, %9 : vector<8x256xf32>
    %13 = arith.addf %12, %6 : vector<8x256xf32>
    %14 = math.tanh %13 : vector<8x256xf32>
    %c0_9 = arith.constant 0 : index
    %c0_10 = arith.constant 0 : index
    %15 = vector.load %arg10[%c0_9, %c0_10] : memref<64x256xf32, #tpu.memory_space<vmem>>, vector<8x256xf32>
    tpu.vector_store %arg10[%c0_9, %c0_10], %14 {strides = array<i32>} : memref<64x256xf32, #tpu.memory_space<vmem>>, vector<8x256xf32>,
    %16 = arith.truncf %14 : vector<8x256xf32> to vector<8x256xbf16>
    %cst_11 = arith.constant dense<0.000000e+00> : vector<8x256xf32>
    %17 = tpu.matmul %16, %3, %cst_11 {dimension_numbers = #tpu.dot_dimension_numbers<[1], [0], [0], [1], [0, 0, 1, 1], [], []>} : vector<8x256xbf16>, vector<256x256xbf16>, vector<8x256xf32> -> vector<8x256xf32>
    %c1 = arith.constant 1 : index
    %c0_12 = arith.constant 0 : index
    %c0_13 = arith.constant 0 : index
    %18 = vector.load %arg1[%c1, %c0_12, %c0_13] : memref<8x8x256xf32, #tpu.memory_space<vmem>>, vector<1x8x256xf32>
    %19 = vector.shape_cast %18 : vector<1x8x256xf32> to vector<8x256xf32>
    %20 = arith.addf %19, %17 : vector<8x256xf32>
    %21 = arith.addf %20, %6 : vector<8x256xf32>
    %22 = math.tanh %21 : vector<8x256xf32>
    %c8 = arith.constant 8 : index
    %c0_14 = arith.constant 0 : index
    %23 = vector.load %arg10[%c8, %c0_14] : memref<64x256xf32, #tpu.memory_space<vmem>>, vector<8x256xf32>
    tpu.vector_store %arg10[%c8, %c0_14], %22 {strides = array<i32>} : memref<64x256xf32, #tpu.memory_space<vmem>>, vector<8x256xf32>,
    %24 = arith.truncf %22 : vector<8x256xf32> to vector<8x256xbf16>
    %cst_15 = arith.constant dense<0.000000e+00> : vector<8x256xf32>
    %25 = tpu.matmul %24, %3, %cst_15 {dimension_numbers = #tpu.dot_dimension_numbers<[1], [0], [0], [1], [0, 0, 1, 1], [], []>} : vector<8x256xbf16>, vector<256x256xbf16>, vector<8x256xf32> -> vector<8x256xf32>
    %c2 = arith.constant 2 : index
    %c0_16 = arith.constant 0 : index
    %c0_17 = arith.constant 0 : index
    %26 = vector.load %arg1[%c2, %c0_16, %c0_17] : memref<8x8x256xf32, #tpu.memory_space<vmem>>, vector<1x8x256xf32>
    %27 = vector.shape_cast %26 : vector<1x8x256xf32> to vector<8x256xf32>
    %28 = arith.addf %27, %25 : vector<8x256xf32>
    %29 = arith.addf %28, %6 : vector<8x256xf32>
    %30 = math.tanh %29 : vector<8x256xf32>
    %c16 = arith.constant 16 : index
    %c0_18 = arith.constant 0 : index
    %31 = vector.load %arg10[%c16, %c0_18] : memref<64x256xf32, #tpu.memory_space<vmem>>, vector<8x256xf32>
    tpu.vector_store %arg10[%c16, %c0_18], %30 {strides = array<i32>} : memref<64x256xf32, #tpu.memory_space<vmem>>, vector<8x256xf32>,
    %32 = arith.truncf %30 : vector<8x256xf32> to vector<8x256xbf16>
    %cst_19 = arith.constant dense<0.000000e+00> : vector<8x256xf32>
    %33 = tpu.matmul %32, %3, %cst_19 {dimension_numbers = #tpu.dot_dimension_numbers<[1], [0], [0], [1], [0, 0, 1, 1], [], []>} : vector<8x256xbf16>, vector<256x256xbf16>, vector<8x256xf32> -> vector<8x256xf32>
    %c3 = arith.constant 3 : index
    %c0_20 = arith.constant 0 : index
    %c0_21 = arith.constant 0 : index
    %34 = vector.load %arg1[%c3, %c0_20, %c0_21] : memref<8x8x256xf32, #tpu.memory_space<vmem>>, vector<1x8x256xf32>
    %35 = vector.shape_cast %34 : vector<1x8x256xf32> to vector<8x256xf32>
    %36 = arith.addf %35, %33 : vector<8x256xf32>
    %37 = arith.addf %36, %6 : vector<8x256xf32>
    %38 = math.tanh %37 : vector<8x256xf32>
    %c24 = arith.constant 24 : index
    %c0_22 = arith.constant 0 : index
    %39 = vector.load %arg10[%c24, %c0_22] : memref<64x256xf32, #tpu.memory_space<vmem>>, vector<8x256xf32>
    tpu.vector_store %arg10[%c24, %c0_22], %38 {strides = array<i32>} : memref<64x256xf32, #tpu.memory_space<vmem>>, vector<8x256xf32>,
    %40 = arith.truncf %38 : vector<8x256xf32> to vector<8x256xbf16>
    %cst_23 = arith.constant dense<0.000000e+00> : vector<8x256xf32>
    %41 = tpu.matmul %40, %3, %cst_23 {dimension_numbers = #tpu.dot_dimension_numbers<[1], [0], [0], [1], [0, 0, 1, 1], [], []>} : vector<8x256xbf16>, vector<256x256xbf16>, vector<8x256xf32> -> vector<8x256xf32>
    %c4 = arith.constant 4 : index
    %c0_24 = arith.constant 0 : index
    %c0_25 = arith.constant 0 : index
    %42 = vector.load %arg1[%c4, %c0_24, %c0_25] : memref<8x8x256xf32, #tpu.memory_space<vmem>>, vector<1x8x256xf32>
    %43 = vector.shape_cast %42 : vector<1x8x256xf32> to vector<8x256xf32>
    %44 = arith.addf %43, %41 : vector<8x256xf32>
    %45 = arith.addf %44, %6 : vector<8x256xf32>
    %46 = math.tanh %45 : vector<8x256xf32>
    %c32 = arith.constant 32 : index
    %c0_26 = arith.constant 0 : index
    %47 = vector.load %arg10[%c32, %c0_26] : memref<64x256xf32, #tpu.memory_space<vmem>>, vector<8x256xf32>
    tpu.vector_store %arg10[%c32, %c0_26], %46 {strides = array<i32>} : memref<64x256xf32, #tpu.memory_space<vmem>>, vector<8x256xf32>,
    %48 = arith.truncf %46 : vector<8x256xf32> to vector<8x256xbf16>
    %cst_27 = arith.constant dense<0.000000e+00> : vector<8x256xf32>
    %49 = tpu.matmul %48, %3, %cst_27 {dimension_numbers = #tpu.dot_dimension_numbers<[1], [0], [0], [1], [0, 0, 1, 1], [], []>} : vector<8x256xbf16>, vector<256x256xbf16>, vector<8x256xf32> -> vector<8x256xf32>
    %c5 = arith.constant 5 : index
    %c0_28 = arith.constant 0 : index
    %c0_29 = arith.constant 0 : index
    %50 = vector.load %arg1[%c5, %c0_28, %c0_29] : memref<8x8x256xf32, #tpu.memory_space<vmem>>, vector<1x8x256xf32>
    %51 = vector.shape_cast %50 : vector<1x8x256xf32> to vector<8x256xf32>
    %52 = arith.addf %51, %49 : vector<8x256xf32>
    %53 = arith.addf %52, %6 : vector<8x256xf32>
    %54 = math.tanh %53 : vector<8x256xf32>
    %c40 = arith.constant 40 : index
    %c0_30 = arith.constant 0 : index
    %55 = vector.load %arg10[%c40, %c0_30] : memref<64x256xf32, #tpu.memory_space<vmem>>, vector<8x256xf32>
    tpu.vector_store %arg10[%c40, %c0_30], %54 {strides = array<i32>} : memref<64x256xf32, #tpu.memory_space<vmem>>, vector<8x256xf32>,
    %56 = arith.truncf %54 : vector<8x256xf32> to vector<8x256xbf16>
    %cst_31 = arith.constant dense<0.000000e+00> : vector<8x256xf32>
    %57 = tpu.matmul %56, %3, %cst_31 {dimension_numbers = #tpu.dot_dimension_numbers<[1], [0], [0], [1], [0, 0, 1, 1], [], []>} : vector<8x256xbf16>, vector<256x256xbf16>, vector<8x256xf32> -> vector<8x256xf32>
    %c6 = arith.constant 6 : index
    %c0_32 = arith.constant 0 : index
    %c0_33 = arith.constant 0 : index
    %58 = vector.load %arg1[%c6, %c0_32, %c0_33] : memref<8x8x256xf32, #tpu.memory_space<vmem>>, vector<1x8x256xf32>
    %59 = vector.shape_cast %58 : vector<1x8x256xf32> to vector<8x256xf32>
    %60 = arith.addf %59, %57 : vector<8x256xf32>
    %61 = arith.addf %60, %6 : vector<8x256xf32>
    %62 = math.tanh %61 : vector<8x256xf32>
    %c48 = arith.constant 48 : index
    %c0_34 = arith.constant 0 : index
    %63 = vector.load %arg10[%c48, %c0_34] : memref<64x256xf32, #tpu.memory_space<vmem>>, vector<8x256xf32>
    tpu.vector_store %arg10[%c48, %c0_34], %62 {strides = array<i32>} : memref<64x256xf32, #tpu.memory_space<vmem>>, vector<8x256xf32>,
    %64 = arith.truncf %62 : vector<8x256xf32> to vector<8x256xbf16>
    %cst_35 = arith.constant dense<0.000000e+00> : vector<8x256xf32>
    %65 = tpu.matmul %64, %3, %cst_35 {dimension_numbers = #tpu.dot_dimension_numbers<[1], [0], [0], [1], [0, 0, 1, 1], [], []>} : vector<8x256xbf16>, vector<256x256xbf16>, vector<8x256xf32> -> vector<8x256xf32>
    %c7 = arith.constant 7 : index
    %c0_36 = arith.constant 0 : index
    %c0_37 = arith.constant 0 : index
    %66 = vector.load %arg1[%c7, %c0_36, %c0_37] : memref<8x8x256xf32, #tpu.memory_space<vmem>>, vector<1x8x256xf32>
    %67 = vector.shape_cast %66 : vector<1x8x256xf32> to vector<8x256xf32>
    %68 = arith.addf %67, %65 : vector<8x256xf32>
    %69 = arith.addf %68, %6 : vector<8x256xf32>
    %70 = math.tanh %69 : vector<8x256xf32>
    %c56 = arith.constant 56 : index
    %c0_38 = arith.constant 0 : index
    %71 = vector.load %arg10[%c56, %c0_38] : memref<64x256xf32, #tpu.memory_space<vmem>>, vector<8x256xf32>
    tpu.vector_store %arg10[%c56, %c0_38], %70 {strides = array<i32>} : memref<64x256xf32, #tpu.memory_space<vmem>>, vector<8x256xf32>,
    %c0_39 = arith.constant 0 : index
    %c0_40 = arith.constant 0 : index
    %72 = vector.load %arg9[%c0_39, %c0_40] : memref<8x256xf32, #tpu.memory_space<vmem>>, vector<8x256xf32>
    tpu.vector_store %arg9[%c0_39, %c0_40], %70 {strides = array<i32>} : memref<8x256xf32, #tpu.memory_space<vmem>>, vector<8x256xf32>,
    %c0_41 = arith.constant 0 : index
    %c0_42 = arith.constant 0 : index
    %c0_43 = arith.constant 0 : index
    %73 = vector.load %arg8[%c0_41, %c0_42, %c0_43] : memref<1x8x256xf32, #tpu.memory_space<vmem>>, vector<1x8x256xf32>
    %74 = vector.shape_cast %73 : vector<1x8x256xf32> to vector<8x256xf32>
    %75 = vector.shape_cast %70 : vector<8x256xf32> to vector<1x8x256xf32>
    tpu.vector_store %arg8[%c0_41, %c0_42, %c0_43], %75 {strides = array<i32>} : memref<1x8x256xf32, #tpu.memory_space<vmem>>, vector<1x8x256xf32>,
    %c0_44 = arith.constant 0 : index
    %c0_45 = arith.constant 0 : index
    %76 = vector.load %arg10[%c0_44, %c0_45] : memref<64x256xf32, #tpu.memory_space<vmem>>, vector<64x256xf32>
    %77 = arith.truncf %76 : vector<64x256xf32> to vector<64x256xbf16>
    %c0_46 = arith.constant 0 : index
    %c0_47 = arith.constant 0 : index
    %78 = vector.load %arg5[%c0_46, %c0_47] : memref<256x128xbf16, #tpu.memory_space<vmem>>, vector<256x128xbf16>
    %cst_48 = arith.constant dense<0.000000e+00> : vector<64x128xf32>
    %79 = tpu.matmul %77, %78, %cst_48 {dimension_numbers = #tpu.dot_dimension_numbers<[1], [0], [0], [1], [0, 0, 1, 1], [], []>} : vector<64x256xbf16>, vector<256x128xbf16>, vector<64x128xf32> -> vector<64x128xf32>
    %c0_49 = arith.constant 0 : index
    %c0_50 = arith.constant 0 : index
    %80 = vector.load %arg6[%c0_49, %c0_50] : memref<1x128xf32, #tpu.memory_space<vmem>>, vector<1x128xf32>
    %81 = vector.broadcast %80 : vector<1x128xf32> to vector<64x128xf32>
    %82 = arith.addf %79, %81 : vector<64x128xf32>
    %c0_51 = arith.constant 0 : index
    %c0_52 = arith.constant 0 : index
    %83 = vector.load %arg7[%c0_51, %c0_52] : memref<64x128xf32, #tpu.memory_space<vmem>>, vector<64x128xf32>
    tpu.vector_store %arg7[%c0_51, %c0_52], %82 {strides = array<i32>} : memref<64x128xf32, #tpu.memory_space<vmem>>, vector<64x128xf32>,
    return
  }
  func.func @transform_0(%arg0: i32) -> (i32, i32, i32) {
    %c0_i32 = arith.constant 0 : i32
    %c0_i32_0 = arith.constant 0 : i32
    %c0_i32_1 = arith.constant 0 : i32
    return %arg0, %c0_i32, %c0_i32_0 : i32, i32, i32
  }
  func.func @transform_1(%arg0: i32) -> (i32, i32, i32) {
    %c0_i32 = arith.constant 0 : i32
    %c0_i32_0 = arith.constant 0 : i32
    %c0_i32_1 = arith.constant 0 : i32
    %c0_i32_2 = arith.constant 0 : i32
    return %c0_i32, %c0_i32_0, %c0_i32_1 : i32, i32, i32
  }
  func.func @transform_2(%arg0: i32) -> (i32, i32) {
    %c0_i32 = arith.constant 0 : i32
    %c0_i32_0 = arith.constant 0 : i32
    %c0_i32_1 = arith.constant 0 : i32
    return %c0_i32, %c0_i32_0 : i32, i32
  }
  func.func @transform_3(%arg0: i32) -> (i32, i32) {
    %c0_i32 = arith.constant 0 : i32
    %c0_i32_0 = arith.constant 0 : i32
    %c0_i32_1 = arith.constant 0 : i32
    return %c0_i32, %c0_i32_0 : i32, i32
  }
  func.func @transform_4(%arg0: i32) -> (i32, i32) {
    %c0_i32 = arith.constant 0 : i32
    %c0_i32_0 = arith.constant 0 : i32
    %c0_i32_1 = arith.constant 0 : i32
    return %c0_i32, %c0_i32_0 : i32, i32
  }
  func.func @transform_5(%arg0: i32) -> (i32, i32) {
    %c0_i32 = arith.constant 0 : i32
    %c0_i32_0 = arith.constant 0 : i32
    %c0_i32_1 = arith.constant 0 : i32
    return %c0_i32, %c0_i32_0 : i32, i32
  }
  func.func @transform_6(%arg0: i32) -> (i32, i32) {
    %c0_i32 = arith.constant 0 : i32
    %c0_i32_0 = arith.constant 0 : i32
    return %arg0, %c0_i32 : i32, i32
  }
  func.func @transform_7(%arg0: i32) -> (i32, i32, i32) {
    %c0_i32 = arith.constant 0 : i32
    %c0_i32_0 = arith.constant 0 : i32
    %c0_i32_1 = arith.constant 0 : i32
    %c0_i32_2 = arith.constant 0 : i32
    return %c0_i32, %c0_i32_0, %c0_i32_1 : i32, i32, i32
  }
}

</mosaic_0001>

<bundles_post_ra>
// kernel: tpu_custom_call.1
= control target key start
LH: loop header
LB: loop body
LE: loop exit
PB: predicated region body
PF: predicated region fallthrough
CT: control target
= control target key end

     0   :  { %13 = vsyncpa [#allocation5], 0  ;;  %s2714_s0 = inlined_call_operand.hbm [shape: f32[16,8,256], index: 0, kind: input, shape index: {}]   ;;  %s2715_s1 = inlined_call_operand.hbm [shape: f32[1,8,256], index: 1, kind: input, shape index: {}]   ;;  %s2716_s2 = inlined_call_operand.hbm [shape: bf16[256,256], index: 2, kind: input, shape index: {}]   ;;  %s2717_s3 = inlined_call_operand.vmem [shape: f32[1,256], index: 3, kind: input, shape index: {}]   ;;  %s2718_s4 = inlined_call_operand.hbm [shape: bf16[256,128], index: 4, kind: input, shape index: {}]   ;;  %s2719_s5 = inlined_call_operand.vmem [shape: f32[1,128], index: 5, kind: input, shape index: {}]   ;;  %s2720_s6 = inlined_call_operand.hbm [shape: f32[128,128], index: 6, kind: output, shape index: {0}]   ;;  %s2721_s7 = inlined_call_operand.hbm [shape: f32[1,8,256], index: 7, kind: output, shape index: {1}]  }
   0x1   :  { %15 = vsyncpa [#allocation5 + $0x1], 0 }
   0x2   :  { %16 = vsyncpa [#allocation8], 0 }
   0x3   :  { %17 = vsyncpa [#allocation11], 0 }
   0x4   :  { %18 = vsyncpa [#allocation6], 0 }
   0x5   :  { %20 = vsyncpa [#allocation6 + $0x1], 0 }
   0x6   :  { %21 = vsyncpa [#allocation14], 0  ;;  %s1969_s24 = smov 0   ;;  %s1971_s25 = smov 0  }
   0x7   :  { %s1973_s26 = smov 0   ;;  %s1975_s27 = smov 0  }
   0x8 LB: > { %s1990_s28 = sadd.s32 4294967295, %s1913_s27   ;;  %s1361_s29 = sadd.s32 4294967294, %s1913_s27   ;;  %s1913_s27 = sphi %s1975_s27, %s2750_s27   ;;  %s1909_s26 = sphi %s1973_s26, %s2749_s26   ;;  %s1905_s25 = sphi %s1971_s25, %s2748_s25   ;;  %s1901_s24 = sphi %s1969_s24, %s2747_s24  }
   0x9   : > { %p47_p0 = scmp.ne.s32.totalorder %s1905_s25, %s1901_s24  ;;  %p2722_p1 = scmp.eq.s32.totalorder %s1990_s28, 0 }
   0xa   : > { %p182_p3 = scmp.eq.s32.totalorder %s1361_s29, 1  ;;  %p1362_p5 = scmp.ge.s32.totalorder %s1913_s27, 1 }
   0xb   : > { %p1999_p4 = por %p2722_p1, %p47_p0  ;;  %p210_p7 = scmp.lt.s32.totalorder %s1913_s27, 3 }
   0xc   : > { %p2004_p6 = por %p182_p3, %p47_p0  ;;  %s1915_s10 = smov [#allocation7]  }
   0xd   : > { %s2725_s30 = scalar_select %p1999_p4, 1, 0 }
   0xe   : > { %s2726_s8 = scalar_select %p2004_p6, 1, 0 }
   0xf   : > { %p2010_p9 = pnand %p1362_p5, %p210_p7  ;;  %s223_s11 = sshll.u32 %s1915_s10, 4  ;;  %s224_s11 = int_to_ptr.vmem [resolvable:$true] %s223_s11 }
  0x10   : > { %s1916_s12 = smov [#allocation9]   ;;  %s1917_s15 = smov [#allocation10]  }
  0x11   : > { %s2727_s9 = scalar_select %p2010_p9, 1, 0 }
  0x12   : > { %p1527_p11 = pneg %p2010_p9  ;;  %s233_s13 = sshll.u32 %s1916_s12, 4  ;;  %s2023_s13 = int_to_ptr.vmem [resolvable:$true] %s233_s13 }
  0x13   : > { %s2025_s16 = sshll.u32 %s1917_s15, 4  ;;  %s1695_s19 = scalar_lea.hbm %s2715_s1, 256  ;;  %s250_s16 = int_to_ptr.vmem [resolvable:$true] %s2025_s16 }
  0x14   : > { %p2019_p12 = pnand %p1527_p11, %p2722_p1  ;;  %p1696_p13 = scmp.ne.s32.totalorder %s2715_s1, %s1695_s19 }
  0x15   : > { %p1702_p7 = scmp.lt.u32.totalorder %s1695_s19, %s2715_s1 }
  0x16   : > { %p2035_p0 = pneg %p2019_p12 }
  0x18   : > { %p1698_p3 = pnand %p2035_p0, %p1696_p13 }
  0x1a   : > { %p1699_p5 = pneg %p1698_p3 }
  0x1c   : > { %p1704_p11 = pnand %p1702_p7, %p1699_p5 }
  0x1e   : > { %1707 = shalt.err (!%p1704_p11)
}
  0x1f   : > { %s1708_s10 = scalar_lea.vmem %s224_s11, 256  ;;  %p1716_p2 = scmp.lt.s32.totalorder %s224_s11, %s224_s11 }
  0x20   : > { %p1709_p10 = scmp.ne.s32.totalorder %s224_s11, %s1708_s10  ;;  %p1717_p6 = scmp.lt.s32.totalorder %s1708_s10, %s1708_s10 }
  0x22   : > { %p1711_p8 = pnand %p1709_p10, %p2035_p0  ;;  %p1718_p4 = por %p1717_p6, %p1716_p2 }
  0x24   : > { %p1712_p1 = pneg %p1711_p8 }
  0x26   : > { %p1719_p9 = pnand %p1718_p4, %p1712_p1 }
  0x28   : > { %1722 = shalt.err (!%p1719_p9)
}
  0x29   : > { %1530 = dma.hbm_to_vmem [thread:$0]  (!%p2019_p12), %s2715_s1, 256, %s224_s11, [#allocation8]  }
  0x2a   : > { %s1723_s19 = scalar_lea.hbm %s2716_s2, 4096 }
  0x2b   : > { %p1724_p8 = scmp.ne.s32.totalorder %s2716_s2, %s1723_s19  ;;  %p1730_p1 = scmp.lt.u32.totalorder %s1723_s19, %s2716_s2 }
  0x2d   : > { %p1726_p10 = pnand %p1724_p8, %p2035_p0 }
  0x2f   : > { %p1727_p2 = pneg %p1726_p10 }
  0x31   : > { %p1732_p4 = pnand %p1730_p1, %p1727_p2 }
  0x33   : > { %1735 = shalt.err (!%p1732_p4)
}
  0x34   : > { %s1736_s11 = scalar_lea.vmem %s2023_s13, 4096  ;;  %p1744_p3 = scmp.lt.s32.totalorder %s2023_s13, %s2023_s13 }
  0x35   : > { %p1737_p6 = scmp.ne.s32.totalorder %s2023_s13, %s1736_s11  ;;  %p1745_p5 = scmp.lt.s32.totalorder %s1736_s11, %s1736_s11 }
  0x37   : > { %p1739_p9 = pnand %p1737_p6, %p2035_p0  ;;  %p1746_p7 = por %p1745_p5, %p1744_p3 }
  0x39   : > { %p1740_p13 = pneg %p1739_p9 }
  0x3b   : > { %p1747_p11 = pnand %p1746_p7, %p1740_p13 }
  0x3d   : > { %1750 = shalt.err (!%p1747_p11)
}
  0x3e   : > { %s1918_s10 = smov 128   ;;  %s1919_s12 = smov 8  }
  0x3f   : > { %1533 = dma.hbm_to_vmem [thread:$0]  (!%p2019_p12), %s2716_s2, 4096, %s2023_s13, [#allocation8], %s1918_s10, %s1918_s10, %s1919_s12  }
  0x40   : > { %s1751_s20 = scalar_lea.hbm %s2718_s4, 2048 }
  0x41   : > { %p1752_p8 = scmp.ne.s32.totalorder %s2718_s4, %s1751_s20  ;;  %p1758_p1 = scmp.lt.u32.totalorder %s1751_s20, %s2718_s4 }
  0x43   : > { %p1754_p10 = pnand %p1752_p8, %p2035_p0 }
  0x45   : > { %p1755_p2 = pneg %p1754_p10 }
  0x47   : > { %p1760_p4 = pnand %p1758_p1, %p1755_p2 }
  0x49   : > { %1763 = shalt.err (!%p1760_p4)
}
  0x4a   : > { %s1764_s15 = scalar_lea.vmem %s250_s16, 2048  ;;  %p1772_p3 = scmp.lt.s32.totalorder %s250_s16, %s250_s16 }
  0x4b   : > { %p1765_p6 = scmp.ne.s32.totalorder %s250_s16, %s1764_s15  ;;  %p1773_p5 = scmp.lt.s32.totalorder %s1764_s15, %s1764_s15 }
  0x4d   : > { %p1767_p9 = pnand %p1765_p6, %p2035_p0  ;;  %p1774_p7 = por %p1773_p5, %p1772_p3 }
  0x4f   : > { %p1768_p13 = pneg %p1767_p9 }
  0x51   : > { %p1775_p11 = pnand %p1774_p7, %p1768_p13 }
  0x53   : > { %1778 = shalt.err (!%p1775_p11)
}
  0x54   : > { %s1920_s13 = smov 64   ;;  %s1921_s22 = smov 4  }
  0x55   : > { %1536 = dma.hbm_to_vmem [thread:$0]  (!%p2019_p12), %s2718_s4, 2048, %s250_s16, [#allocation11], %s1920_s13, %s1920_s13, %s1921_s22  }
  0x56   : > { %s2094_s17 = sadd.s32 1, %s1913_s27   ;;  %s34_s19 = sadd.s32 1, %s1909_s26 }
  0x57   : > { %s31_s18 = ssub.s32 %s1913_s27, %s2094_s17  ;;  %p41_p8 = scmp.ne.s32.totalorder %s1909_s26, %s1905_s25 }
  0x58   : > { %p32_p0 = scmp.eq.s32.totalorder %s31_s18, 0  ;;  %p42_p10 = scmp.eq.s32.totalorder %s1913_s27, 0 }
  0x59   : > { %p1548_p2 = scmp.lt.s32.totalorder %s1913_s27, 2  ;;  %p2730_p4 = scmp.eq.s32.totalorder %s1990_s28, 1 }
  0x5a   : > { %s2104_s20 = scalar_select %p32_p0, %s1909_s26, %s34_s19  }
  0x5b   : > { %p43_p1 = por %p42_p10, %p41_p8  ;;  %p2108_p6 = por %p2730_p4, %p41_p8 }
  0x5c   : > { %s266_s14 = sand.u32 1, %s1909_s26   ;;  %s1449_s23 = sshll.u32 %s1913_s27, 11 }
  0x5d   : > { %s1367_s16 = sshll.u32 %s266_s14, 7  ;;  %s2117_s15 = scalar_lea.hbm %s2714_s0, %s1449_s23 }
  0x5e   : > { %s270_s13 = scalar_lea.vmem [#allocation4], %s1367_s16  ;;  %p2119_p12 = pnand %p1548_p2, %p43_p1 }
  0x5f   : > { %s278_s22 = sshll.u32 %s270_s13, 4  ;;  %s2125_s12 = scalar_lea.sflag [#allocation5], %s266_s14  ;;  %s2123_s22 = int_to_ptr.vmem [resolvable:$true] %s278_s22 }
  0x60   : > { %s1779_s18 = scalar_lea.hbm %s2117_s15, 2048  ;;  %p1781_p13 = pneg %p2119_p12 }
  0x61   : > { %p1780_p9 = scmp.ne.s32.totalorder %s2117_s15, %s1779_s18  ;;  %s1784_s16 = scalar_lea.hbm %s2714_s0, 4096 }
  0x62   : > { %p1785_p7 = scmp.lt.u32.totalorder %s2117_s15, %s2714_s0  ;;  %p1786_p11 = scmp.lt.u32.totalorder %s1784_s16, %s1779_s18 }
  0x63   : > { %p1782_p3 = pnand %p1781_p13, %p1780_p9  ;;  %p1788_p8 = scmp.lt.u32.totalorder %s1779_s18, %s2117_s15 }
  0x64   : > { %p1787_p0 = por %p1786_p11, %p1785_p7 }
  0x65   : > { %p1783_p5 = pneg %p1782_p3 }
  0x66   : > { %p1789_p10 = por %p1788_p8, %p1787_p0 }
  0x68   : > { %p1790_p2 = pnand %p1789_p10, %p1783_p5 }
  0x6a   : > { %1793 = shalt.err (!%p1790_p2)
}
  0x6b   : > { %s1794_s14 = scalar_lea.vmem %s2123_s22, 2048  ;;  %s1922_s13 = smov [#allocation4]  }
  0x6c   : > { %p1795_p1 = scmp.ne.s32.totalorder %s2123_s22, %s1794_s14  ;;  %s1799_s19 = sshll.u32 %s1922_s13, 4  ;;  %s1800_s19 = int_to_ptr.vmem [resolvable:$false] %s1799_s19 }
  0x6d   : > { %s1801_s23 = scalar_lea.vmem %s1800_s19, 4096  ;;  %p1802_p3 = scmp.lt.s32.totalorder %s2123_s22, %s1800_s19 }
  0x6e   : > { %p1797_p4 = pnand %p1795_p1, %p1781_p13  ;;  %p1803_p7 = scmp.lt.s32.totalorder %s1801_s23, %s1794_s14 }
  0x70   : > { %p1798_p9 = pneg %p1797_p4  ;;  %p1804_p11 = por %p1803_p7, %p1802_p3 }
  0x72   : > { %p1805_p0 = pnand %p1804_p11, %p1798_p9 }
  0x74   : > { %1808 = shalt.err (!%p1805_p0)
}
  0x75   : > { %s1923_s18 = smov 256   ;;  %s1924_s16 = smov 16  }
  0x76   : > { %1540 = dma.hbm_to_vmem [thread:$0]  (!%p2119_p12), %s2117_s15, 2048, %s2123_s22, %s2125_s12, %s1923_s18, %s1923_s18, %s1924_s16  }
  0x77   : > { %p2733_p13 = scmp.ne.s32.totalorder %s2727_s9, 0 }
  0x78   : > { %s2156_s29 = sand.u32 (!%p2733_p13), 1, %s1905_s25   ;;  %p2734_p5 = scmp.ne.s32.totalorder (!%p2733_p13), %s2725_s30, 0 }
  0x79   : > { %290 = sbr.rel (%p2733_p13) target bundleno = 2297 (0x8f9), region = 44  ;;  %s1372_s11 = sshll.u32 (!%p2733_p13), %s2156_s29, 7 }
  0x7a   : > { %s293_s14 = scalar_lea.sflag (!%p2733_p13), [#allocation5], %s2156_s29  ;;  %s2160_s13 = scalar_lea.vmem (!%p2733_p13), [#allocation4], %s1372_s11 }
  0x80   : > { %1880 = dma.done.wait (%p2734_p5), %s293_s14, 2048  }
  0x81   : > { %1882 = vsyncadd (%p2734_p5), %s293_s14, 4294965248  ;;  %p2735_p12 = scmp.eq.s32.totalorder %s1990_s28, 0 }
  0x83   : > { %1884 = dma.done.wait (%p2735_p12), [#allocation8], 4352   ;;  %p2736_p8 = pmov %p2735_p12 }
  0x85   : > { %1886 = vsyncadd (%p2736_p8), [#allocation8], 4294962944  ;;  %p2737_p10 = pmov %p2736_p8 }
  0x86   : > { %p2738_p2 = pmov %p2736_p8 }
  0x87   : > { %1888 = dma.done.wait (%p2737_p10), [#allocation11], 2048  }
  0x88   : > { %1890 = vsyncadd (%p2738_p2), [#allocation11], 4294965248  ;;  %s1376_s9 = sshll.u32 %s2156_s29, 6  ;;  %p2739_p1 = scmp.ne.s32.totalorder %s1990_s28, 0 }
  0x89   : > { %s2175_s15 = scalar_lea.vmem [#allocation12], %s1376_s9  ;;  %v346_v0 = vld [vmem:[#allocation7] sm:$0xff] (!%p2739_p1)  ;;  %v347_v1 = vld [vmem:[#allocation7 + $0x8] sm:$0xff] (!%p2739_p1) }
  0x8a   : > { %345 = sbr.rel (%p2739_p1) target bundleno = 145 (0x91), region = 64  ;;  %348 = vst [vmem:[#allocation2] sm:$0xff] (!%p2739_p1), %v346_v0  ;;  %349 = vst [vmem:[#allocation2 + $0x8] sm:$0xff] (!%p2739_p1), %v347_v1 }
  0x91 PF: > { %v2179_v2 = vld [vmem:[#allocation9 + $0x4] ss:$8 sps:$4 sm:$0xff]   ;;  %v2181_v3 = vld [vmem:[#allocation9] ss:$8 sps:$4 sm:$0xff]   ;;  %v2184_v4 = vld [vmem:[#allocation9 + $0x14] ss:$8 sps:$4 sm:$0xff]   ;;  %v384_v38 = vlaneseq }
  0x92   : > { %558 = vmatprep.subr.bf16.mxu0 %v2179_v2  ;;  %611 = vmatprep.subr.bf16.mxu1 %v2179_v2  ;;  %v2188_v5 = vld [vmem:[#allocation9 + $0x10] ss:$8 sps:$4 sm:$0xff]   ;;  %v2192_v6 = vld [vmem:[#allocation9 + $0x24] ss:$8 sps:$4 sm:$0xff]   ;;  %v2196_v7 = vld [vmem:[#allocation9 + $0x20] ss:$8 sps:$4 sm:$0xff]  }
  0x93   : > { %559 = vmatpush1.bf16.msra.mxu0 %v2181_v3  ;;  %612 = vmatpush1.bf16.msra.mxu1 %v2181_v3  ;;  %v2200_v8 = vld [vmem:[#allocation9 + $0x34] ss:$8 sps:$4 sm:$0xff]   ;;  %v2204_v9 = vld [vmem:[#allocation9 + $0x30] ss:$8 sps:$4 sm:$0xff]   ;;  %v2208_v10 = vld [vmem:[#allocation9 + $0x44] ss:$8 sps:$4 sm:$0xff]  }
  0x94   : > { %560 = vmatprep.subr.bf16.mxu0 %v2184_v4  ;;  %613 = vmatprep.subr.bf16.mxu1 %v2184_v4  ;;  %v2212_v11 = vld [vmem:[#allocation9 + $0x40] ss:$8 sps:$4 sm:$0xff]   ;;  %v2216_v12 = vld [vmem:[#allocation9 + $0x54] ss:$8 sps:$4 sm:$0xff]   ;;  %v2220_v13 = vld [vmem:[#allocation9 + $0x50] ss:$8 sps:$4 sm:$0xff]  }
  0x95   : > { %v2224_v14 = vld [vmem:[#allocation9 + $0x64] ss:$8 sps:$4 sm:$0xff]   ;;  %v2227_v15 = vld [vmem:[#allocation9 + $0x60] ss:$8 sps:$4 sm:$0xff]   ;;  %v2229_v17 = vld [vmem:[#allocation9 + $0x74] ss:$8 sps:$4 sm:$0xff]  }
  0x96   : > { %v395_v16 = vld [vmem:[#allocation2 + $0x8] sm:$0xff]  ;;  %v2234_v19 = vld [vmem:[#allocation9 + $0x70] ss:$8 sps:$4 sm:$0xff]   ;;  %v2245_v22 = vld [vmem:[#allocation9 + $0x94] ss:$8 sps:$4 sm:$0xff]   ;;  %v385_v39 = vshrl.u32 %v384_v38, 7 }
  0x97   : > { %561 = vmatpush1.bf16.msra.mxu0 %v2188_v5  ;;  %614 = vmatpush1.bf16.msra.mxu1 %v2188_v5  ;;  %v397_v18 = vpack.c.bf16 %v395_v16, %v395_v16  ;;  %v2237_v20 = vld [vmem:[#allocation9 + $0x84] ss:$8 sps:$4 sm:$0xff]   ;;  %v2243_v21 = vld [vmem:[#allocation9 + $0x80] ss:$8 sps:$4 sm:$0xff]   ;;  %v2252_v23 = vld [vmem:[#allocation9 + $0x90] ss:$8 sps:$4 sm:$0xff]  }
  0x98   : > { %562 = vmatprep.subr.bf16.mxu0 %v2192_v6  ;;  %615 = vmatprep.subr.bf16.mxu1 %v2192_v6  ;;  %v2256_v24 = vld [vmem:[#allocation9 + $0xa4] ss:$8 sps:$4 sm:$0xff]   ;;  %v2260_v25 = vld [vmem:[#allocation9 + $0xa0] ss:$8 sps:$4 sm:$0xff]   ;;  %v2264_v26 = vld [vmem:[#allocation9 + $0xb4] ss:$8 sps:$4 sm:$0xff]  }
  0x99   : > { %590 = vmatprep.mubr.bf16.mxu0 %v397_v18  ;;  %v2268_v27 = vld [vmem:[#allocation9 + $0xb0] ss:$8 sps:$4 sm:$0xff]   ;;  %v2272_v28 = vld [vmem:[#allocation9 + $0xc4] ss:$8 sps:$4 sm:$0xff]   ;;  %v2276_v29 = vld [vmem:[#allocation9 + $0xc0] ss:$8 sps:$4 sm:$0xff]  }
  0x9a   : > { %v2280_v30 = vld [vmem:[#allocation9 + $0xd4] ss:$8 sps:$4 sm:$0xff]   ;;  %v2284_v31 = vld [vmem:[#allocation9 + $0xd0] ss:$8 sps:$4 sm:$0xff]   ;;  %v2288_v32 = vld [vmem:[#allocation9 + $0xe4] ss:$8 sps:$4 sm:$0xff]  }
  0x9b   : > { %563 = vmatpush1.bf16.msra.mxu0 %v2196_v7  ;;  %616 = vmatpush1.bf16.msra.mxu1 %v2196_v7  ;;  %v2292_v33 = vld [vmem:[#allocation9 + $0xe0] ss:$8 sps:$4 sm:$0xff]   ;;  %v2296_v34 = vld [vmem:[#allocation9 + $0xf4] ss:$8 sps:$4 sm:$0xff]   ;;  %v2300_v35 = vld [vmem:[#allocation9 + $0xf0] ss:$8 sps:$4 sm:$0xff]  }
  0x9c   : > { %564 = vmatprep.subr.bf16.mxu0 %v2200_v8  ;;  %617 = vmatprep.subr.bf16.mxu1 %v2200_v8  ;;  %v394_v36 = vld [vmem:[#allocation2] sm:$0xff]  ;;  %v386_v40 = vsub.s32 0, %v385_v39  ;;  %v390_v42 = vsub.s32 1, %v385_v39  ;;  %v599_v43 = vld [vmem:[%s2160_s13] sm:$0xff]  ;;  %v600_v45 = vld [vmem:[%s2160_s13 + $0x8] sm:$0xff]  ;;  %s1925_s19 = smov [#allocation13]  }
  0x9d   : > { %v396_v37 = vpack.c.bf16 %v394_v36, %v394_v36  ;;  %v382_v41 = vld [vmem:[%s2717_s3] sm:$0x3]  ;;  %v1411_v60 = vld [vmem:[%s2160_s13 + $0x18] sm:$0xff]  ;;  %s1251_s23 = sshll.u32 %s1925_s19, 4  ;;  %p2740_p9 = scmp.eq.s32.totalorder %s1990_s28, 1  ;;  %s1252_s23 = int_to_ptr.vmem [resolvable:$true] %s1251_s23 }
  0x9e   : > { %v2345_v44 = vrot.slane %v382_v41, %v386_v40  ;;  %v2348_v47 = vrot.slane %v382_v41, %v390_v42  ;;  %v1410_v59 = vld [vmem:[%s2160_s13 + $0x10] sm:$0xff]  ;;  %v1412_v41 = vld [vmem:[%s2160_s13 + $0x20] sm:$0xff]  ;;  %v1413_v42 = vld [vmem:[%s2160_s13 + $0x28] sm:$0xff]  ;;  %s1809_s18 = scalar_lea.vmem %s1252_s23, 256  ;;  %p1816_p11 = scmp.lt.s32.totalorder %s1252_s23, %s1252_s23 }
  0x9f   : > { %565 = vmatpush1.bf16.msra.mxu0 %v2204_v9  ;;  %618 = vmatpush1.bf16.msra.mxu1 %v2204_v9  ;;  %p1810_p4 = scmp.ne.s32.totalorder %s1252_s23, %s1809_s18  ;;  %p1817_p0 = scmp.lt.s32.totalorder %s1809_s18, %s1809_s18 }
  0xa0   : > { %566 = vmatprep.subr.bf16.mxu0 %v2208_v10  ;;  %619 = vmatprep.subr.bf16.mxu1 %v2208_v10 }
  0xa1   : > { %p1811_p3 = pnand %p1810_p4, %p2740_p9  ;;  %p1818_p13 = por %p1817_p0, %p1816_p11 }
  0xa3   : > { %567 = vmatpush1.bf16.msra.mxu0 %v2212_v11  ;;  %620 = vmatpush1.bf16.msra.mxu1 %v2212_v11  ;;  %p1812_p7 = pneg %p1811_p3 }
  0xa4   : > { %568 = vmatprep.subr.bf16.mxu0 %v2216_v12  ;;  %621 = vmatprep.subr.bf16.mxu1 %v2216_v12 }
  0xa5   : > { %p1819_p5 = pnand %p1818_p13, %p1812_p7 }
  0xa7   : > { %569 = vmatpush1.bf16.msra.mxu0 %v2220_v13  ;;  %622 = vmatpush1.bf16.msra.mxu1 %v2220_v13 }
  0xa8   : > { %570 = vmatprep.subr.bf16.mxu0 %v2224_v14  ;;  %623 = vmatprep.subr.bf16.mxu1 %v2224_v14 }
  0xab   : > { %571 = vmatpush1.bf16.msra.mxu0 %v2227_v15  ;;  %624 = vmatpush1.bf16.msra.mxu1 %v2227_v15 }
  0xac   : > { %572 = vmatprep.subr.bf16.mxu0 %v2229_v17  ;;  %625 = vmatprep.subr.bf16.mxu1 %v2229_v17 }
  0xaf   : > { %573 = vmatpush1.bf16.msra.mxu0 %v2234_v19  ;;  %626 = vmatpush1.bf16.msra.mxu1 %v2234_v19 }
  0xb0   : > { %574 = vmatprep.subr.bf16.mxu0 %v2237_v20  ;;  %627 = vmatprep.subr.bf16.mxu1 %v2237_v20 }
  0xb3   : > { %575 = vmatpush1.bf16.msra.mxu0 %v2243_v21  ;;  %628 = vmatpush1.bf16.msra.mxu1 %v2243_v21 }
  0xb4   : > { %576 = vmatprep.subr.bf16.mxu0 %v2245_v22  ;;  %629 = vmatprep.subr.bf16.mxu1 %v2245_v22 }
  0xb7   : > { %577 = vmatpush1.bf16.msra.mxu0 %v2252_v23  ;;  %630 = vmatpush1.bf16.msra.mxu1 %v2252_v23 }
  0xb8   : > { %578 = vmatprep.subr.bf16.mxu0 %v2256_v24  ;;  %631 = vmatprep.subr.bf16.mxu1 %v2256_v24 }
  0xbb   : > { %579 = vmatpush1.bf16.msra.mxu0 %v2260_v25  ;;  %632 = vmatpush1.bf16.msra.mxu1 %v2260_v25 }
  0xbc   : > { %580 = vmatprep.subr.bf16.mxu0 %v2264_v26  ;;  %633 = vmatprep.subr.bf16.mxu1 %v2264_v26 }
  0xbf   : > { %581 = vmatpush1.bf16.msra.mxu0 %v2268_v27  ;;  %634 = vmatpush1.bf16.msra.mxu1 %v2268_v27 }
  0xc0   : > { %582 = vmatprep.subr.bf16.mxu0 %v2272_v28  ;;  %635 = vmatprep.subr.bf16.mxu1 %v2272_v28 }
  0xc3   : > { %583 = vmatpush1.bf16.msra.mxu0 %v2276_v29  ;;  %636 = vmatpush1.bf16.msra.mxu1 %v2276_v29 }
  0xc4   : > { %584 = vmatprep.subr.bf16.mxu0 %v2280_v30  ;;  %637 = vmatprep.subr.bf16.mxu1 %v2280_v30 }
  0xc7   : > { %585 = vmatpush1.bf16.msra.mxu0 %v2284_v31  ;;  %638 = vmatpush1.bf16.msra.mxu1 %v2284_v31 }
  0xc8   : > { %586 = vmatprep.subr.bf16.mxu0 %v2288_v32  ;;  %639 = vmatprep.subr.bf16.mxu1 %v2288_v32 }
  0xcb   : > { %587 = vmatpush1.bf16.msra.mxu0 %v2292_v33  ;;  %640 = vmatpush1.bf16.msra.mxu1 %v2292_v33 }
  0xcc   : > { %588 = vmatprep.subr.bf16.mxu0 %v2296_v34  ;;  %641 = vmatprep.subr.bf16.mxu1 %v2296_v34 }
  0xcf   : > { %589 = vmatpush1.bf16.msra.mxu0 %v2300_v35  ;;  %642 = vmatpush1.bf16.msra.mxu1 %v2300_v35 }
  0xd0   : > { %665 = vmatprep.subr.bf16.mxu0 %v2179_v2  ;;  %719 = vmatprep.subr.bf16.mxu1 %v2179_v2 }
  0xd2   : > { %591 = vmatmul.mubr.bf16.vlgmr.msra.gmra.mrb[0].mxu0 %v396_v37 }
  0xd3   : > { %666 = vmatpush1.bf16.msra.mxu0 %v2181_v3 }
  0xd4   : > { %667 = vmatprep.subr.bf16.mxu0 %v2184_v4 }
  0xd7   : > { %668 = vmatpush1.bf16.msra.mxu0 %v2188_v5 }
  0xd8   : > { %669 = vmatprep.subr.bf16.mxu0 %v2192_v6 }
  0xdb   : > { %670 = vmatpush1.bf16.msra.mxu0 %v2196_v7 }
  0xdc   : > { %671 = vmatprep.subr.bf16.mxu0 %v2200_v8 }
  0xdf   : > { %672 = vmatpush1.bf16.msra.mxu0 %v2204_v9 }
  0xe0   : > { %673 = vmatprep.subr.bf16.mxu0 %v2208_v10 }
  0xe3   : > { %674 = vmatpush1.bf16.msra.mxu0 %v2212_v11 }
  0xe4   : > { %675 = vmatprep.subr.bf16.mxu0 %v2216_v12 }
  0xe7   : > { %676 = vmatpush1.bf16.msra.mxu0 %v2220_v13 }
  0xe8   : > { %677 = vmatprep.subr.bf16.mxu0 %v2224_v14 }
  0xeb   : > { %678 = vmatpush1.bf16.msra.mxu0 %v2227_v15 }
  0xec   : > { %679 = vmatprep.subr.bf16.mxu0 %v2229_v17 }
  0xef   : > { %680 = vmatpush1.bf16.msra.mxu0 %v2234_v19 }
  0xf0   : > { %681 = vmatprep.subr.bf16.mxu0 %v2237_v20 }
  0xf3   : > { %682 = vmatpush1.bf16.msra.mxu0 %v2243_v21 }
  0xf4   : > { %683 = vmatprep.subr.bf16.mxu0 %v2245_v22 }
  0xf7   : > { %684 = vmatpush1.bf16.msra.mxu0 %v2252_v23 }
  0xf8   : > { %685 = vmatprep.subr.bf16.mxu0 %v2256_v24 }
  0xfb   : > { %686 = vmatpush1.bf16.msra.mxu0 %v2260_v25 }
  0xfc   : > { %687 = vmatprep.subr.bf16.mxu0 %v2264_v26 }
  0xff   : > { %688 = vmatpush1.bf16.msra.mxu0 %v2268_v27 }
 0x100   : > { %689 = vmatprep.subr.bf16.mxu0 %v2272_v28 }
 0x103   : > { %690 = vmatpush1.bf16.msra.mxu0 %v2276_v29 }
 0x104   : > { %691 = vmatprep.subr.bf16.mxu0 %v2280_v30 }
 0x107   : > { %692 = vmatpush1.bf16.msra.mxu0 %v2284_v31 }
 0x108   : > { %693 = vmatprep.subr.bf16.mxu0 %v2288_v32 }
 0x10b   : > { %694 = vmatpush1.bf16.msra.mxu0 %v2292_v33 }
 0x10c   : > { %695 = vmatprep.subr.bf16.mxu0 %v2296_v34 }
 0x10f   : > { %696 = vmatpush1.bf16.msra.mxu0 %v2300_v35 }
 0x110   : > { %773 = vmatprep.subr.bf16.mxu0 %v2179_v2 }
 0x1a5   : > { %v592_v46 = vpop.f32.mrb[0].mxu0 }
 0x1a6   : > { %v601_v48 = vadd.f32 %v599_v43, %v592_v46  ;;  %v594_v49 = vpop.f32.mrb[1].mxu0 }
 0x1a7   : > { %v602_v50 = vadd.f32 %v600_v45, %v594_v49  ;;  %v596_v51 = vpop.f32.mrb[2].mxu0 }
 0x1a8   : > { %v603_v52 = vadd.f32 %v601_v48, %v2345_v44  ;;  %v597_v53 = vpop.f32.mrb[3].mxu0 }
 0x1a9   : > { %v604_v54 = vadd.f32 %v602_v50, %v2348_v47 }
 0x1aa   : > { %1663 = vtanh.f32 %v603_v52 }
 0x1ab   : > { %1665 = vtanh.f32 %v604_v54 }
 0x1b4   : > { %v2352_v55 = vpop.eup %1663 }
 0x1b5   : > { %v2354_v56 = vpop.eup %1665  ;;  %v609_v58 = vpack.c.bf16 %v2352_v55, %v2352_v55 }
 0x1b6   : > { %v610_v57 = vpack.c.bf16 %v2354_v56, %v2354_v56 }
 0x1b8   : > { %643 = vmatprep.mubr.bf16.mxu1 %v610_v57 }
 0x1b9   : > { %644 = vmatmul.mubr.bf16.vlgmr.msra.gmra.mrb[0].mxu1 %v609_v58 }
 0x1ba   : > { %720 = vmatpush1.bf16.msra.mxu1 %v2181_v3 }
 0x1bb   : > { %721 = vmatprep.subr.bf16.mxu1 %v2184_v4 }
 0x1be   : > { %722 = vmatpush1.bf16.msra.mxu1 %v2188_v5 }
 0x1bf   : > { %723 = vmatprep.subr.bf16.mxu1 %v2192_v6 }
 0x1c2   : > { %724 = vmatpush1.bf16.msra.mxu1 %v2196_v7 }
 0x1c3   : > { %725 = vmatprep.subr.bf16.mxu1 %v2200_v8 }
 0x1c6   : > { %726 = vmatpush1.bf16.msra.mxu1 %v2204_v9 }
 0x1c7   : > { %727 = vmatprep.subr.bf16.mxu1 %v2208_v10 }
 0x1ca   : > { %728 = vmatpush1.bf16.msra.mxu1 %v2212_v11 }
 0x1cb   : > { %729 = vmatprep.subr.bf16.mxu1 %v2216_v12 }
 0x1ce   : > { %730 = vmatpush1.bf16.msra.mxu1 %v2220_v13 }
 0x1cf   : > { %731 = vmatprep.subr.bf16.mxu1 %v2224_v14 }
 0x1d2   : > { %732 = vmatpush1.bf16.msra.mxu1 %v2227_v15 }
 0x1d3   : > { %733 = vmatprep.subr.bf16.mxu1 %v2229_v17 }
 0x1d6   : > { %734 = vmatpush1.bf16.msra.mxu1 %v2234_v19 }
 0x1d7   : > { %735 = vmatprep.subr.bf16.mxu1 %v2237_v20 }
 0x1da   : > { %736 = vmatpush1.bf16.msra.mxu1 %v2243_v21 }
 0x1db   : > { %737 = vmatprep.subr.bf16.mxu1 %v2245_v22 }
 0x1de   : > { %738 = vmatpush1.bf16.msra.mxu1 %v2252_v23 }
 0x1df   : > { %739 = vmatprep.subr.bf16.mxu1 %v2256_v24 }
 0x1e2   : > { %740 = vmatpush1.bf16.msra.mxu1 %v2260_v25 }
 0x1e3   : > { %741 = vmatprep.subr.bf16.mxu1 %v2264_v26 }
 0x1e6   : > { %742 = vmatpush1.bf16.msra.mxu1 %v2268_v27 }
 0x1e7   : > { %743 = vmatprep.subr.bf16.mxu1 %v2272_v28 }
 0x1ea   : > { %744 = vmatpush1.bf16.msra.mxu1 %v2276_v29 }
 0x1eb   : > { %745 = vmatprep.subr.bf16.mxu1 %v2280_v30 }
 0x1ee   : > { %746 = vmatpush1.bf16.msra.mxu1 %v2284_v31 }
 0x1ef   : > { %747 = vmatprep.subr.bf16.mxu1 %v2288_v32 }
 0x1f2   : > { %748 = vmatpush1.bf16.msra.mxu1 %v2292_v33 }
 0x1f3   : > { %749 = vmatprep.subr.bf16.mxu1 %v2296_v34 }
 0x1f6   : > { %750 = vmatpush1.bf16.msra.mxu1 %v2300_v35 }
 0x1f7   : > { %827 = vmatprep.subr.bf16.mxu1 %v2179_v2 }
 0x28c   : > { %v645_v61 = vpop.f32.mrb[0].mxu1 }
 0x28d   : > { %v655_v62 = vadd.f32 %v1410_v59, %v645_v61  ;;  %v647_v63 = vpop.f32.mrb[1].mxu1  ;;  %v1414_v59 = vld [vmem:[%s2160_s13 + $0x30] sm:$0xff] }
 0x28e   : > { %v656_v0 = vadd.f32 %v1411_v60, %v647_v63  ;;  %v649_v1 = vpop.f32.mrb[2].mxu1  ;;  %v1415_v60 = vld [vmem:[%s2160_s13 + $0x38] sm:$0xff] }
 0x28f   : > { %v657_v16 = vadd.f32 %v655_v62, %v2345_v44  ;;  %v650_v18 = vpop.f32.mrb[3].mxu1 }
 0x290   : > { %v658_v36 = vadd.f32 %v656_v0, %v2348_v47 }
 0x291   : > { %1667 = vtanh.f32 %v657_v16 }
 0x292   : > { %1669 = vtanh.f32 %v658_v36 }
 0x29b   : > { %v2396_v37 = vpop.eup %1667 }
 0x29c   : > { %v2398_v38 = vpop.eup %1669  ;;  %v663_v40 = vpack.c.bf16 %v2396_v37, %v2396_v37 }
 0x29d   : > { %v664_v39 = vpack.c.bf16 %v2398_v38, %v2398_v38 }
 0x29f   : > { %697 = vmatprep.mubr.bf16.mxu0 %v664_v39 }
 0x2a0   : > { %698 = vmatmul.mubr.bf16.vlgmr.msra.gmra.mrb[4].mxu0 %v663_v40 }
 0x2a1   : > { %774 = vmatpush1.bf16.msra.mxu0 %v2181_v3 }
 0x2a2   : > { %775 = vmatprep.subr.bf16.mxu0 %v2184_v4 }
 0x2a5   : > { %776 = vmatpush1.bf16.msra.mxu0 %v2188_v5 }
 0x2a6   : > { %777 = vmatprep.subr.bf16.mxu0 %v2192_v6 }
 0x2a9   : > { %778 = vmatpush1.bf16.msra.mxu0 %v2196_v7 }
 0x2aa   : > { %779 = vmatprep.subr.bf16.mxu0 %v2200_v8 }
 0x2ad   : > { %780 = vmatpush1.bf16.msra.mxu0 %v2204_v9 }
 0x2ae   : > { %781 = vmatprep.subr.bf16.mxu0 %v2208_v10 }
 0x2b1   : > { %782 = vmatpush1.bf16.msra.mxu0 %v2212_v11 }
 0x2b2   : > { %783 = vmatprep.subr.bf16.mxu0 %v2216_v12 }
 0x2b5   : > { %784 = vmatpush1.bf16.msra.mxu0 %v2220_v13 }
 0x2b6   : > { %785 = vmatprep.subr.bf16.mxu0 %v2224_v14 }
 0x2b9   : > { %786 = vmatpush1.bf16.msra.mxu0 %v2227_v15 }
 0x2ba   : > { %787 = vmatprep.subr.bf16.mxu0 %v2229_v17 }
 0x2bd   : > { %788 = vmatpush1.bf16.msra.mxu0 %v2234_v19 }
 0x2be   : > { %789 = vmatprep.subr.bf16.mxu0 %v2237_v20 }
 0x2c1   : > { %790 = vmatpush1.bf16.msra.mxu0 %v2243_v21 }
 0x2c2   : > { %791 = vmatprep.subr.bf16.mxu0 %v2245_v22 }
 0x2c5   : > { %792 = vmatpush1.bf16.msra.mxu0 %v2252_v23 }
 0x2c6   : > { %793 = vmatprep.subr.bf16.mxu0 %v2256_v24 }
 0x2c9   : > { %794 = vmatpush1.bf16.msra.mxu0 %v2260_v25 }
 0x2ca   : > { %795 = vmatprep.subr.bf16.mxu0 %v2264_v26 }
 0x2cd   : > { %796 = vmatpush1.bf16.msra.mxu0 %v2268_v27 }
 0x2ce   : > { %797 = vmatprep.subr.bf16.mxu0 %v2272_v28 }
 0x2d1   : > { %798 = vmatpush1.bf16.msra.mxu0 %v2276_v29 }
 0x2d2   : > { %799 = vmatprep.subr.bf16.mxu0 %v2280_v30 }
 0x2d5   : > { %800 = vmatpush1.bf16.msra.mxu0 %v2284_v31 }
 0x2d6   : > { %801 = vmatprep.subr.bf16.mxu0 %v2288_v32 }
 0x2d9   : > { %802 = vmatpush1.bf16.msra.mxu0 %v2292_v33 }
 0x2da   : > { %803 = vmatprep.subr.bf16.mxu0 %v2296_v34 }
 0x2dd   : > { %804 = vmatpush1.bf16.msra.mxu0 %v2300_v35 }
 0x2de   : > { %881 = vmatprep.subr.bf16.mxu0 %v2179_v2 }
 0x373   : > { %v699_v43 = vpop.f32.mrb[4].mxu0 }
 0x374   : > { %v709_v45 = vadd.f32 %v1412_v41, %v699_v43  ;;  %v701_v46 = vpop.f32.mrb[5].mxu0  ;;  %v1417_v43 = vld [vmem:[%s2160_s13 + $0x48] sm:$0xff] }
 0x375   : > { %v710_v48 = vadd.f32 %v1413_v42, %v701_v46  ;;  %v703_v49 = vpop.f32.mrb[6].mxu0  ;;  %v1416_v42 = vld [vmem:[%s2160_s13 + $0x40] sm:$0xff] }
 0x376   : > { %v711_v50 = vadd.f32 %v709_v45, %v2345_v44  ;;  %v704_v51 = vpop.f32.mrb[7].mxu0 }
 0x377   : > { %v712_v52 = vadd.f32 %v710_v48, %v2348_v47 }
 0x378   : > { %1671 = vtanh.f32 %v711_v50 }
 0x379   : > { %1673 = vtanh.f32 %v712_v52 }
 0x382   : > { %v2440_v53 = vpop.eup %1671 }
 0x383   : > { %v2442_v54 = vpop.eup %1673  ;;  %v717_v58 = vpack.c.bf16 %v2440_v53, %v2440_v53 }
 0x384   : > { %v718_v57 = vpack.c.bf16 %v2442_v54, %v2442_v54 }
 0x386   : > { %751 = vmatprep.mubr.bf16.mxu1 %v718_v57 }
 0x387   : > { %752 = vmatmul.mubr.bf16.vlgmr.msra.gmra.mrb[4].mxu1 %v717_v58 }
 0x388   : > { %828 = vmatpush1.bf16.msra.mxu1 %v2181_v3 }
 0x389   : > { %829 = vmatprep.subr.bf16.mxu1 %v2184_v4 }
 0x38c   : > { %830 = vmatpush1.bf16.msra.mxu1 %v2188_v5 }
 0x38d   : > { %831 = vmatprep.subr.bf16.mxu1 %v2192_v6 }
 0x390   : > { %832 = vmatpush1.bf16.msra.mxu1 %v2196_v7 }
 0x391   : > { %833 = vmatprep.subr.bf16.mxu1 %v2200_v8 }
 0x394   : > { %834 = vmatpush1.bf16.msra.mxu1 %v2204_v9 }
 0x395   : > { %835 = vmatprep.subr.bf16.mxu1 %v2208_v10 }
 0x398   : > { %836 = vmatpush1.bf16.msra.mxu1 %v2212_v11 }
 0x399   : > { %837 = vmatprep.subr.bf16.mxu1 %v2216_v12 }
 0x39c   : > { %838 = vmatpush1.bf16.msra.mxu1 %v2220_v13 }
 0x39d   : > { %839 = vmatprep.subr.bf16.mxu1 %v2224_v14 }
 0x3a0   : > { %840 = vmatpush1.bf16.msra.mxu1 %v2227_v15 }
 0x3a1   : > { %841 = vmatprep.subr.bf16.mxu1 %v2229_v17 }
 0x3a4   : > { %842 = vmatpush1.bf16.msra.mxu1 %v2234_v19 }
 0x3a5   : > { %843 = vmatprep.subr.bf16.mxu1 %v2237_v20 }
 0x3a8   : > { %844 = vmatpush1.bf16.msra.mxu1 %v2243_v21 }
 0x3a9   : > { %845 = vmatprep.subr.bf16.mxu1 %v2245_v22 }
 0x3ac   : > { %846 = vmatpush1.bf16.msra.mxu1 %v2252_v23 }
 0x3ad   : > { %847 = vmatprep.subr.bf16.mxu1 %v2256_v24 }
 0x3b0   : > { %848 = vmatpush1.bf16.msra.mxu1 %v2260_v25 }
 0x3b1   : > { %849 = vmatprep.subr.bf16.mxu1 %v2264_v26 }
 0x3b4   : > { %850 = vmatpush1.bf16.msra.mxu1 %v2268_v27 }
 0x3b5   : > { %851 = vmatprep.subr.bf16.mxu1 %v2272_v28 }
 0x3b8   : > { %852 = vmatpush1.bf16.msra.mxu1 %v2276_v29 }
 0x3b9   : > { %853 = vmatprep.subr.bf16.mxu1 %v2280_v30 }
 0x3bc   : > { %854 = vmatpush1.bf16.msra.mxu1 %v2284_v31 }
 0x3bd   : > { %855 = vmatprep.subr.bf16.mxu1 %v2288_v32 }
 0x3c0   : > { %856 = vmatpush1.bf16.msra.mxu1 %v2292_v33 }
 0x3c1   : > { %857 = vmatprep.subr.bf16.mxu1 %v2296_v34 }
 0x3c4   : > { %858 = vmatpush1.bf16.msra.mxu1 %v2300_v35 }
 0x3c5   : > { %935 = vmatprep.subr.bf16.mxu1 %v2179_v2 }
 0x45a   : > { %v753_v61 = vpop.f32.mrb[4].mxu1 }
 0x45b   : > { %v763_v62 = vadd.f32 %v1414_v59, %v753_v61  ;;  %v755_v63 = vpop.f32.mrb[5].mxu1 }
 0x45c   : > { %v764_v0 = vadd.f32 %v1415_v60, %v755_v63  ;;  %v757_v1 = vpop.f32.mrb[6].mxu1  ;;  %v1420_v63 = vld [vmem:[%s2160_s13 + $0x60] sm:$0xff] }
 0x45d   : > { %v765_v16 = vadd.f32 %v763_v62, %v2345_v44  ;;  %v758_v18 = vpop.f32.mrb[7].mxu1 }
 0x45e   : > { %v766_v36 = vadd.f32 %v764_v0, %v2348_v47  ;;  %v1421_v0 = vld [vmem:[%s2160_s13 + $0x68] sm:$0xff] }
 0x45f   : > { %1675 = vtanh.f32 %v765_v16 }
 0x460   : > { %1677 = vtanh.f32 %v766_v36 }
 0x469   : > { %v2484_v39 = vpop.eup %1675 }
 0x46a   : > { %v2486_v40 = vpop.eup %1677  ;;  %v771_v41 = vpack.c.bf16 %v2484_v39, %v2484_v39  ;;  %v1009_v62 = vpack.c.bf16 %v2484_v39, %v2440_v53 }
 0x46b   : > { %v772_v2 = vpack.c.bf16 %v2486_v40, %v2486_v40 }
 0x46d   : > { %805 = vmatprep.mubr.bf16.mxu0 %v772_v2 }
 0x46e   : > { %806 = vmatmul.mubr.bf16.vlgmr.msra.gmra.mrb[8].mxu0 %v771_v41 }
 0x46f   : > { %882 = vmatpush1.bf16.msra.mxu0 %v2181_v3 }
 0x470   : > { %883 = vmatprep.subr.bf16.mxu0 %v2184_v4 }
 0x473   : > { %884 = vmatpush1.bf16.msra.mxu0 %v2188_v5 }
 0x474   : > { %885 = vmatprep.subr.bf16.mxu0 %v2192_v6 }
 0x477   : > { %886 = vmatpush1.bf16.msra.mxu0 %v2196_v7 }
 0x478   : > { %887 = vmatprep.subr.bf16.mxu0 %v2200_v8 }
 0x47b   : > { %888 = vmatpush1.bf16.msra.mxu0 %v2204_v9 }
 0x47c   : > { %889 = vmatprep.subr.bf16.mxu0 %v2208_v10 }
 0x47f   : > { %890 = vmatpush1.bf16.msra.mxu0 %v2212_v11 }
 0x480   : > { %891 = vmatprep.subr.bf16.mxu0 %v2216_v12 }
 0x483   : > { %892 = vmatpush1.bf16.msra.mxu0 %v2220_v13 }
 0x484   : > { %893 = vmatprep.subr.bf16.mxu0 %v2224_v14 }
 0x487   : > { %894 = vmatpush1.bf16.msra.mxu0 %v2227_v15 }
 0x488   : > { %895 = vmatprep.subr.bf16.mxu0 %v2229_v17 }
 0x48b   : > { %896 = vmatpush1.bf16.msra.mxu0 %v2234_v19 }
 0x48c   : > { %897 = vmatprep.subr.bf16.mxu0 %v2237_v20 }
 0x48f   : > { %898 = vmatpush1.bf16.msra.mxu0 %v2243_v21 }
 0x490   : > { %899 = vmatprep.subr.bf16.mxu0 %v2245_v22 }
 0x493   : > { %900 = vmatpush1.bf16.msra.mxu0 %v2252_v23 }
 0x494   : > { %901 = vmatprep.subr.bf16.mxu0 %v2256_v24 }
 0x497   : > { %902 = vmatpush1.bf16.msra.mxu0 %v2260_v25 }
 0x498   : > { %903 = vmatprep.subr.bf16.mxu0 %v2264_v26 }
 0x49b   : > { %904 = vmatpush1.bf16.msra.mxu0 %v2268_v27 }
 0x49c   : > { %905 = vmatprep.subr.bf16.mxu0 %v2272_v28 }
 0x49f   : > { %906 = vmatpush1.bf16.msra.mxu0 %v2276_v29 }
 0x4a0   : > { %907 = vmatprep.subr.bf16.mxu0 %v2280_v30 }
 0x4a3   : > { %908 = vmatpush1.bf16.msra.mxu0 %v2284_v31 }
 0x4a4   : > { %909 = vmatprep.subr.bf16.mxu0 %v2288_v32 }
 0x4a7   : > { %910 = vmatpush1.bf16.msra.mxu0 %v2292_v33 }
 0x4a8   : > { %911 = vmatprep.subr.bf16.mxu0 %v2296_v34 }
 0x4ab   : > { %912 = vmatpush1.bf16.msra.mxu0 %v2300_v35 }
 0x541   : > { %v807_v45 = vpop.f32.mrb[8].mxu0 }
 0x542   : > { %v817_v46 = vadd.f32 %v1416_v42, %v807_v45  ;;  %v809_v48 = vpop.f32.mrb[9].mxu0  ;;  %v2612_v45 = vld [vmem:[%s2719_s5] ss:$0 sm:$0xff] }
 0x543   : > { %v818_v49 = vadd.f32 %v1417_v43, %v809_v48  ;;  %v811_v50 = vpop.f32.mrb[10].mxu0 }
 0x544   : > { %v819_v51 = vadd.f32 %v817_v46, %v2345_v44  ;;  %v812_v52 = vpop.f32.mrb[11].mxu0 }
 0x545   : > { %v820_v57 = vadd.f32 %v818_v49, %v2348_v47 }
 0x546   : > { %1679 = vtanh.f32 %v819_v51 }
 0x547   : > { %1681 = vtanh.f32 %v820_v57 }
 0x550   : > { %v2527_v58 = vpop.eup %1679 }
 0x551   : > { %v2529_v59 = vpop.eup %1681  ;;  %v825_v61 = vpack.c.bf16 %v2527_v58, %v2527_v58 }
 0x552   : > { %v826_v60 = vpack.c.bf16 %v2529_v59, %v2529_v59 }
 0x554   : > { %859 = vmatprep.mubr.bf16.mxu1 %v826_v60 }
 0x555   : > { %860 = vmatmul.mubr.bf16.vlgmr.msra.gmra.mrb[8].mxu1 %v825_v61 }
 0x556   : > { %936 = vmatpush1.bf16.msra.mxu1 %v2181_v3  ;;  %v1647_v3 = vld [vmem:[#allocation10 + $0x40] sm:$0xff]  }
 0x557   : > { %937 = vmatprep.subr.bf16.mxu1 %v2184_v4  ;;  %1451 = vmatprep.subr.bf16.mxu0 %v1647_v3  ;;  %v1418_v4 = vld [vmem:[%s2160_s13 + $0x50] sm:$0xff] }
 0x55a   : > { %938 = vmatpush1.bf16.msra.mxu1 %v2188_v5  ;;  %v1419_v5 = vld [vmem:[%s2160_s13 + $0x58] sm:$0xff] }
 0x55b   : > { %939 = vmatprep.subr.bf16.mxu1 %v2192_v6 }
 0x55e   : > { %940 = vmatpush1.bf16.msra.mxu1 %v2196_v7 }
 0x55f   : > { %941 = vmatprep.subr.bf16.mxu1 %v2200_v8 }
 0x562   : > { %942 = vmatpush1.bf16.msra.mxu1 %v2204_v9 }
 0x563   : > { %943 = vmatprep.subr.bf16.mxu1 %v2208_v10 }
 0x566   : > { %944 = vmatpush1.bf16.msra.mxu1 %v2212_v11 }
 0x567   : > { %945 = vmatprep.subr.bf16.mxu1 %v2216_v12 }
 0x56a   : > { %946 = vmatpush1.bf16.msra.mxu1 %v2220_v13 }
 0x56b   : > { %947 = vmatprep.subr.bf16.mxu1 %v2224_v14 }
 0x56e   : > { %948 = vmatpush1.bf16.msra.mxu1 %v2227_v15 }
 0x56f   : > { %949 = vmatprep.subr.bf16.mxu1 %v2229_v17 }
 0x572   : > { %950 = vmatpush1.bf16.msra.mxu1 %v2234_v19  ;;  %v1648_v19 = vld [vmem:[#allocation10] sm:$0xff]  }
 0x573   : > { %951 = vmatprep.subr.bf16.mxu1 %v2237_v20 }
 0x576   : > { %952 = vmatpush1.bf16.msra.mxu1 %v2243_v21  ;;  %v1649_v21 = vld [vmem:[#allocation10 + $0x48] sm:$0xff]  }
 0x577   : > { %953 = vmatprep.subr.bf16.mxu1 %v2245_v22  ;;  %v1008_v22 = vpack.c.bf16 %v2398_v38, %v2354_v56  ;;  %v1007_v56 = vpack.c.bf16 %v2396_v37, %v2352_v55  ;;  %v1010_v38 = vpack.c.bf16 %v2486_v40, %v2442_v54 }
 0x57a   : > { %954 = vmatpush1.bf16.msra.mxu1 %v2252_v23  ;;  %v1650_v23 = vld [vmem:[#allocation10 + $0x8] sm:$0xff]  }
 0x57b   : > { %955 = vmatprep.subr.bf16.mxu1 %v2256_v24  ;;  %v1651_v24 = vld [vmem:[#allocation10 + $0x50] sm:$0xff]  }
 0x57e   : > { %956 = vmatpush1.bf16.msra.mxu1 %v2260_v25  ;;  %v1652_v25 = vld [vmem:[#allocation10 + $0x10] sm:$0xff]  }
 0x57f   : > { %957 = vmatprep.subr.bf16.mxu1 %v2264_v26  ;;  %v1653_v26 = vld [vmem:[#allocation10 + $0x58] sm:$0xff]  }
 0x582   : > { %958 = vmatpush1.bf16.msra.mxu1 %v2268_v27  ;;  %v1654_v27 = vld [vmem:[#allocation10 + $0x18] sm:$0xff]  }
 0x583   : > { %959 = vmatprep.subr.bf16.mxu1 %v2272_v28  ;;  %v1655_v28 = vld [vmem:[#allocation10 + $0x60] sm:$0xff]  }
 0x586   : > { %960 = vmatpush1.bf16.msra.mxu1 %v2276_v29  ;;  %v1656_v29 = vld [vmem:[#allocation10 + $0x20] sm:$0xff]  }
 0x587   : > { %961 = vmatprep.subr.bf16.mxu1 %v2280_v30  ;;  %v1657_v30 = vld [vmem:[#allocation10 + $0x68] sm:$0xff]  }
 0x58a   : > { %962 = vmatpush1.bf16.msra.mxu1 %v2284_v31  ;;  %v1658_v31 = vld [vmem:[#allocation10 + $0x28] sm:$0xff]  }
 0x58b   : > { %963 = vmatprep.subr.bf16.mxu1 %v2288_v32  ;;  %v1659_v32 = vld [vmem:[#allocation10 + $0x70] sm:$0xff]  }
 0x58e   : > { %964 = vmatpush1.bf16.msra.mxu1 %v2292_v33  ;;  %v2580_v33 = vld [vmem:[#allocation10 + $0x30] sm:$0xff]  }
 0x58f   : > { %965 = vmatprep.subr.bf16.mxu1 %v2296_v34  ;;  %v2582_v34 = vld [vmem:[#allocation10 + $0x78] sm:$0xff]  }
 0x592   : > { %966 = vmatpush1.bf16.msra.mxu1 %v2300_v35  ;;  %v2585_v35 = vld [vmem:[#allocation10 + $0x38] sm:$0xff]  }
 0x593   : > { %1491 = vmatprep.subr.bf16.mxu1 %v1647_v3 }
 0x628   : > { %v861_v6 = vpop.f32.mrb[8].mxu1 }
 0x629   : > { %v871_v7 = vadd.f32 %v1418_v4, %v861_v6  ;;  %v863_v8 = vpop.f32.mrb[9].mxu1 }
 0x62a   : > { %v872_v9 = vadd.f32 %v1419_v5, %v863_v8  ;;  %v865_v10 = vpop.f32.mrb[10].mxu1 }
 0x62b   : > { %v873_v11 = vadd.f32 %v871_v7, %v2345_v44  ;;  %v866_v12 = vpop.f32.mrb[11].mxu1  ;;  %v1423_v10 = vld [vmem:[%s2160_s13 + $0x78] sm:$0xff] }
 0x62c   : > { %v874_v13 = vadd.f32 %v872_v9, %v2348_v47  ;;  %v1422_v9 = vld [vmem:[%s2160_s13 + $0x70] sm:$0xff] }
 0x62d   : > { %1683 = vtanh.f32 %v873_v11 }
 0x62e   : > { %1685 = vtanh.f32 %v874_v13 }
 0x637   : > { %v2570_v14 = vpop.eup %1683 }
 0x638   : > { %v2572_v15 = vpop.eup %1685  ;;  %v879_v20 = vpack.c.bf16 %v2570_v14, %v2570_v14  ;;  %v1011_v8 = vpack.c.bf16 %v2570_v14, %v2527_v58 }
 0x639   : > { %v880_v17 = vpack.c.bf16 %v2572_v15, %v2572_v15  ;;  %v1012_v40 = vpack.c.bf16 %v2572_v15, %v2529_v59 }
 0x63b   : > { %913 = vmatprep.mubr.bf16.mxu0 %v880_v17 }
 0x63c   : > { %914 = vmatmul.mubr.bf16.vlgmr.msra.gmra.mrb[12].mxu0 %v879_v20 }
 0x63d   : > { %1452 = vmatpush3.bf16.msra.mxu0 %v1648_v19  ;;  %1182 = vmatprep.mubr.bf16.mxu0 %v1008_v22 }
 0x63e   : > { %1453 = vmatprep.subr.bf16.mxu0 %v1649_v21 }
 0x641   : > { %1454 = vmatpush3.bf16.msra.mxu0 %v1650_v23 }
 0x642   : > { %1455 = vmatprep.subr.bf16.mxu0 %v1651_v24 }
 0x645   : > { %1456 = vmatpush3.bf16.msra.mxu0 %v1652_v25 }
 0x646   : > { %1457 = vmatprep.subr.bf16.mxu0 %v1653_v26 }
 0x649   : > { %1458 = vmatpush3.bf16.msra.mxu0 %v1654_v27 }
 0x64a   : > { %1459 = vmatprep.subr.bf16.mxu0 %v1655_v28 }
 0x64d   : > { %1460 = vmatpush3.bf16.msra.mxu0 %v1656_v29 }
 0x64e   : > { %1461 = vmatprep.subr.bf16.mxu0 %v1657_v30 }
 0x651   : > { %1462 = vmatpush3.bf16.msra.mxu0 %v1658_v31 }
 0x652   : > { %1463 = vmatprep.subr.bf16.mxu0 %v1659_v32 }
 0x655   : > { %1464 = vmatpush3.bf16.msra.mxu0 %v2580_v33 }
 0x656   : > { %1465 = vmatprep.subr.bf16.mxu0 %v2582_v34 }
 0x659   : > { %1466 = vmatpush3.bf16.msra.mxu0 %v2585_v35 }
 0x65c   : > { %1183 = vmatmul.mubr.bf16.vlgmr.msra.gmra.mrb[16].mxu0 %v1007_v56 }
 0x65d   : > { %1190 = vmatprep.mubr.bf16.mxu0 %v1010_v38 }
 0x664   : > { %1191 = vmatmul.mubr.bf16.gmra.mrb[20].mxu0 %v1009_v62 }
 0x70f   : > { %v915_v1 = vpop.f32.mrb[12].mxu0 }
 0x710   : > { %v925_v16 = vadd.f32 %v1420_v63, %v915_v1  ;;  %v917_v18 = vpop.f32.mrb[13].mxu0 }
 0x711   : > { %v926_v36 = vadd.f32 %v1421_v0, %v917_v18  ;;  %v919_v2 = vpop.f32.mrb[14].mxu0 }
 0x712   : > { %v927_v41 = vadd.f32 %v925_v16, %v2345_v44  ;;  %v920_v42 = vpop.f32.mrb[15].mxu0 }
 0x713   : > { %v928_v55 = vadd.f32 %v926_v36, %v2348_v47 }
 0x714   : > { %1687 = vtanh.f32 %v927_v41 }
 0x715   : > { %1689 = vtanh.f32 %v928_v55 }
 0x71e   : > { %v2599_v37 = vpop.eup %1687 }
 0x71f   : > { %v2601_v54 = vpop.eup %1689  ;;  %v933_v39 = vpack.c.bf16 %v2599_v37, %v2599_v37 }
 0x720   : > { %v934_v53 = vpack.c.bf16 %v2601_v54, %v2601_v54 }
 0x722   : > { %967 = vmatprep.mubr.bf16.mxu1 %v934_v53 }
 0x723   : > { %968 = vmatmul.mubr.bf16.vlgmr.msra.gmra.mrb[12].mxu1 %v933_v39 }
 0x724   : > { %1499 = vmatpush3.bf16.msra.mxu1 %v1648_v19  ;;  %1198 = vmatprep.mubr.bf16.mxu1 %v1012_v40 }
 0x725   : > { %1492 = vmatprep.subr.bf16.mxu1 %v1649_v21 }
 0x728   : > { %1500 = vmatpush3.bf16.msra.mxu1 %v1650_v23 }
 0x729   : > { %1493 = vmatprep.subr.bf16.mxu1 %v1651_v24 }
 0x72c   : > { %1501 = vmatpush3.bf16.msra.mxu1 %v1652_v25 }
 0x72d   : > { %1494 = vmatprep.subr.bf16.mxu1 %v1653_v26 }
 0x72f   : > { %v1467_v43 = vpop.f32.mrb[16].mxu0 }
 0x730   : > { %1502 = vmatpush3.bf16.msra.mxu1 %v1654_v27  ;;  %v1468_v46 = vpop.f32.mrb[17].mxu0 }
 0x731   : > { %v1469_v48 = vadd.f32 %v1468_v46, %v1467_v43  ;;  %v1470_v49 = vpop.f32.mrb[18].mxu0  ;;  %1495 = vmatprep.subr.bf16.mxu1 %v1655_v28 }
 0x732   : > { %v1471_v50 = vpop.f32.mrb[19].mxu0 }
 0x733   : > { %v1185_v51 = vadd.f32 %v1469_v48, %v2612_v45  ;;  %v1472_v52 = vadd.f32 %v1471_v50, %v1470_v49 }
 0x734   : > { %1503 = vmatpush3.bf16.msra.mxu1 %v1656_v29 }
 0x735   : > { %1215 = vst [vmem:[%s2175_s15] sm:$0xff] %v1185_v51  ;;  %v1188_v57 = vadd.f32 %v1472_v52, %v2612_v45  ;;  %1496 = vmatprep.subr.bf16.mxu1 %v1657_v30 }
 0x737   : > { %1216 = vst [vmem:[%s2175_s15 + $0x8] sm:$0xff] %v1188_v57  ;;  %v1473_v59 = vpop.f32.mrb[20].mxu0 }
 0x738   : > { %1504 = vmatpush3.bf16.msra.mxu1 %v1658_v31  ;;  %v1474_v60 = vpop.f32.mrb[21].mxu0 }
 0x739   : > { %v1475_v61 = vadd.f32 %v1474_v60, %v1473_v59  ;;  %v1476_v3 = vpop.f32.mrb[22].mxu0  ;;  %1497 = vmatprep.subr.bf16.mxu1 %v1659_v32 }
 0x73a   : > { %v1477_v4 = vpop.f32.mrb[23].mxu0 }
 0x73b   : > { %v1193_v5 = vadd.f32 %v1475_v61, %v2612_v45  ;;  %v1478_v6 = vadd.f32 %v1477_v4, %v1476_v3 }
 0x73c   : > { %1505 = vmatpush3.bf16.msra.mxu1 %v2580_v33 }
 0x73d   : > { %1217 = vst [vmem:[%s2175_s15 + $0x10] sm:$0xff] %v1193_v5  ;;  %v1196_v7 = vadd.f32 %v1478_v6, %v2612_v45  ;;  %1498 = vmatprep.subr.bf16.mxu1 %v2582_v34 }
 0x73f   : > { %1218 = vst [vmem:[%s2175_s15 + $0x18] sm:$0xff] %v1196_v7 }
 0x740   : > { %1506 = vmatpush3.bf16.msra.mxu1 %v2585_v35 }
 0x743   : > { %1199 = vmatmul.mubr.bf16.vlgmr.msra.gmra.mrb[16].mxu1 %v1011_v8 }
 0x7f6   : > { %v969_v11 = vpop.f32.mrb[12].mxu1 }
 0x7f7   : > { %v979_v12 = vadd.f32 %v1422_v9, %v969_v11  ;;  %v971_v13 = vpop.f32.mrb[13].mxu1 }
 0x7f8   : > { %v980_v15 = vadd.f32 %v1423_v10, %v971_v13  ;;  %v973_v17 = vpop.f32.mrb[14].mxu1 }
 0x7f9   : > { %v981_v19 = vadd.f32 %v979_v12, %v2345_v44  ;;  %v974_v20 = vpop.f32.mrb[15].mxu1 }
 0x7fa   : > { %v982_v21 = vadd.f32 %v980_v15, %v2348_v47 }
 0x7fb   : > { %1691 = vtanh.f32 %v981_v19 }
 0x7fc   : > { %1693 = vtanh.f32 %v982_v21 }
 0x805   : > { %v1692_v22 = vpop.eup %1691 }
 0x806   : > { %v1694_v23 = vpop.eup %1693  ;;  %987 = vst [vmem:[#allocation2] sm:$0xff] %v1692_v22  ;;  %989 = vst [vmem:[#allocation13] sm:$0xff] %v1692_v22  ;;  %v1013_v14 = vpack.c.bf16 %v1692_v22, %v2599_v37 }
 0x807   : > { %988 = vst [vmem:[#allocation2 + $0x8] sm:$0xff] %v1694_v23  ;;  %990 = vst [vmem:[#allocation13 + $0x8] sm:$0xff] %v1694_v23  ;;  %v1014_v58 = vpack.c.bf16 %v1694_v23, %v2601_v54 }
 0x809   : > { %1206 = vmatprep.mubr.bf16.mxu1 %v1014_v58 }
 0x80a   : > { %1207 = vmatmul.mubr.bf16.gmra.mrb[20].mxu1 %v1013_v14 }
 0x816   : > { %v1479_v44 = vpop.f32.mrb[16].mxu1 }
 0x817   : > { %v1480_v24 = vpop.f32.mrb[17].mxu1 }
 0x818   : > { %v1481_v47 = vadd.f32 %v1480_v24, %v1479_v44  ;;  %v1482_v25 = vpop.f32.mrb[18].mxu1 }
 0x819   : > { %v1483_v26 = vpop.f32.mrb[19].mxu1 }
 0x81a   : > { %v1201_v27 = vadd.f32 %v1481_v47, %v2612_v45  ;;  %v1484_v28 = vadd.f32 %v1483_v26, %v1482_v25 }
 0x81c   : > { %1219 = vst [vmem:[%s2175_s15 + $0x20] sm:$0xff] %v1201_v27  ;;  %v1204_v29 = vadd.f32 %v1484_v28, %v2612_v45 }
 0x81e   : > { %1220 = vst [vmem:[%s2175_s15 + $0x28] sm:$0xff] %v1204_v29 }
 0x81f   : > { %1822 = shalt.err (!%p1819_p5)
}
 0x820   : > { %s1823_s14 = scalar_lea.hbm %s2721_s7, 256  ;;  %p2741_p8 = pmov %p2740_p9 }
 0x821   : > { %p1824_p12 = scmp.ne.s32.totalorder %s2721_s7, %s1823_s14  ;;  %p1829_p1 = scmp.lt.u32.totalorder %s1823_s14, %s2721_s7 }
 0x823   : > { %p1825_p10 = pnand %p1824_p12, %p2741_p8 }
 0x825   : > { %p1826_p2 = pneg %p1825_p10 }
 0x827   : > { %p1831_p4 = pnand %p1829_p1, %p1826_p2 }
 0x829   : > { %1834 = shalt.err (!%p1831_p4)
}
 0x82a   : > { %p2742_p9 = pmov %p2741_p8  ;;  %s1450_s19 = sshll.u32 %s1990_s28, 10 }
 0x82b   : > { %s1237_s18 = sshll.u32 %s2175_s15, 4  ;;  %s2661_s14 = scalar_lea.hbm %s2720_s6, %s1450_s19  ;;  %s2663_s18 = int_to_ptr.vmem [resolvable:$true] %s1237_s18 }
 0x82c   : > { %1523 = dma.vmem_to_hbm [thread:$0]  (%p2742_p9), %s1252_s23, 256, %s2721_s7, [#allocation14]  }
 0x82d   : > { %s1224_s23 = scalar_lea.sflag [#allocation6], %s2156_s29  ;;  %s1835_s13 = scalar_lea.vmem %s2663_s18, 1024 }
 0x82e   : > { %p1836_p3 = scmp.ne.s32.totalorder %s2663_s18, %s1835_s13  ;;  %s1926_s9 = smov [#allocation12]  }
 0x82f   : > { %s1839_s30 = sshll.u32 %s1926_s9, 4  ;;  %s1840_s30 = int_to_ptr.vmem [resolvable:$false] %s1839_s30 }
 0x830   : > { %p1837_p7 = pnand %p1836_p3, %p2108_p6  ;;  %s1841_s22 = scalar_lea.vmem %s1840_s30, 2048 }
 0x831   : > { %p1842_p0 = scmp.lt.s32.totalorder %s2663_s18, %s1840_s30  ;;  %p1843_p13 = scmp.lt.s32.totalorder %s1841_s22, %s1835_s13 }
 0x832   : > { %p1838_p11 = pneg %p1837_p7 }
 0x833   : > { %p1844_p5 = por %p1843_p13, %p1842_p0 }
 0x835   : > { %p1845_p12 = pnand %p1844_p5, %p1838_p11 }
 0x8dd   : > { %v1485_v30 = vpop.f32.mrb[20].mxu1 }
 0x8de   : > { %v1486_v31 = vpop.f32.mrb[21].mxu1 }
 0x8df   : > { %v1487_v32 = vadd.f32 %v1486_v31, %v1485_v30  ;;  %v1488_v33 = vpop.f32.mrb[22].mxu1 }
 0x8e0   : > { %v1489_v34 = vpop.f32.mrb[23].mxu1 }
 0x8e1   : > { %v1209_v35 = vadd.f32 %v1487_v32, %v2612_v45  ;;  %v1490_v56 = vadd.f32 %v1489_v34, %v1488_v33 }
 0x8e3   : > { %1221 = vst [vmem:[%s2175_s15 + $0x30] sm:$0xff] %v1209_v35  ;;  %v1212_v38 = vadd.f32 %v1490_v56, %v2612_v45 }
 0x8e5   : > { %1222 = vst [vmem:[%s2175_s15 + $0x38] sm:$0xff] %v1212_v38 }
 0x8e6   : > { %1848 = shalt.err (!%p1845_p12)
}
 0x8e7   : > { %s1849_s15 = scalar_lea.hbm %s2661_s14, 1024  ;;  %s1853_s19 = scalar_lea.hbm %s2720_s6, 2048 }
 0x8e8   : > { %p1850_p8 = scmp.ne.s32.totalorder %s2661_s14, %s1849_s15  ;;  %p1854_p1 = scmp.lt.u32.totalorder %s2661_s14, %s2720_s6 }
 0x8e9   : > { %p1855_p4 = scmp.lt.u32.totalorder %s1853_s19, %s1849_s15  ;;  %p1857_p3 = scmp.lt.u32.totalorder %s1849_s15, %s2661_s14 }
 0x8ea   : > { %p1851_p10 = pnand %p1850_p8, %p2108_p6 }
 0x8eb   : > { %p1856_p9 = por %p1855_p4, %p1854_p1 }
 0x8ec   : > { %p1852_p2 = pneg %p1851_p10 }
 0x8ed   : > { %p1858_p7 = por %p1857_p3, %p1856_p9 }
 0x8ef   : > { %p1859_p11 = pnand %p1858_p7, %p1852_p2 }
 0x8f1   : > { %1862 = shalt.err (!%p1859_p11)
}
 0x8f2   : > { %s1927_s13 = smov 128   ;;  %s1928_s9 = smov 8  }
 0x8f3   : > { %1521 = dma.vmem_to_hbm [thread:$0]  (%p2108_p6), %s2663_s18, 1024, %s2661_s14, %s1224_s23, %s1927_s13, %s1927_s13, %s1928_s9  }
 0x8f4   : > { %p2743_p0 = scmp.eq.s32.totalorder %s1990_s28, 1 }
 0x8f6   : > { %1892 = dma.done.wait (%p2743_p0), [#allocation14], 256   ;;  %p2744_p13 = pmov %p2743_p0 }
 0x8f8   : > { %1894 = vsyncadd (%p2744_p13), [#allocation14], 4294967040 }
 0x8f9 PF: > { %s1267_s30 = sand.u32 1, %s1901_s24   ;;  %p2745_p5 = scmp.ne.s32.totalorder %s2726_s8, 0 }
 0x8fa   : > { %p2746_p12 = scmp.ge.s32.totalorder %s1913_s27, 2  ;;  %s1268_s22 = scalar_lea.sflag [#allocation6], %s1267_s30 }
 0x8fc   : > { %p1542_p8 = pnand %p2746_p12, %p2745_p5 }
 0x8fe   : > { %1896 = dma.done.wait (!%p1542_p8), %s1268_s22, 1024  }
 0x8ff   : > { %1898 = vsyncadd (!%p1542_p8), %s1268_s22, 4294966272  ;;  %p24_p6 = scmp.ge.s32.totalorder %s2094_s17, 4   ;;  %s2747_s24 = smov %s1905_s25 }
 0x900   : > { %s2748_s25 = smov %s1909_s26  ;;  %s2749_s26 = smov %s2104_s20 }
 0x901   : > { %s2750_s27 = smov %s2094_s17  ;;  %26 = sbr.rel (!%p24_p6) target bundleno = 8 (0x8), region = 120 }
 0x908   :  { %1273 = vsyncpa [#allocation5], 1 }
 0x909   :  { %1275 = vsyncpa [#allocation5 + $0x1], 1 }
 0x90a   :  { %1276 = vsyncpa [#allocation8], 1 }
 0x90b   :  { %1277 = vsyncpa [#allocation11], 1 }
 0x90c   :  { %1278 = vsyncpa [#allocation6], 1 }
 0x90d   :  { %1280 = vsyncpa [#allocation6 + $0x1], 1 }
 0x90e   :  { %1281 = vsyncpa [#allocation14], 1 }

</bundles_post_ra>
